<compile_context>
chip_gen: v5e
topology: v5e:2x2
jax: 0.10.0
libtpu: 0.0.40
codegen_flags: <defaults>
</compile_context>

<pallas_src>
import numpy as np
import jax
import jax.numpy as jnp
from jax.experimental import pallas as pl
from jax.experimental.pallas import tpu as pltpu

# ------------------------- problem sizes (small, synthetic graph) -------------------------
N = 8              # graph nodes                  (n_features[0])
F_IN = 16          # per-node input features      (n_features[1])
HID = 32           # GCN hidden width
VAL_HID = 512      # value-head hidden width
NF = N * F_IN      # 128  flattened per-state GCN input width
NH = N * HID       # 256  flattened per-state GCN hidden width == conv_out_size

TILE_B = 128       # states per grid step: value-head M=128 rows, lane-dense output row
S_TOTAL = 256      # total states per call (RL-stepping amortization pattern)

# bf16 weight-slab row layout:  [ K1 | K2 | Wv1 ]  (lanes 0:NH used for K1/K2)
_K1_R0, _K1_R1 = 0, NF
_K2_R0, _K2_R1 = NF, NF + NH
_WV1_R0, _WV1_R1 = NF + NH, NF + 2 * NH
W_ROWS = NF + 2 * NH                      # 640


# ------------------------------------ Pallas kernel ---------------------------------------
def _critic_kernel(x_ref, wslab_ref, pslab_ref, out_ref):
    # x_ref     : (TILE_B, NF)      f32   -- one tile of flattened states
    # wslab_ref : (W_ROWS, VAL_HID) bf16  -- K1 = kron(A^T,W1), K2 = kron(A^T,W2), Wv1
    # pslab_ref : (8, VAL_HID)      f32   -- tiled b1, tiled b2, bv1, wv2^T, bv2
    # out_ref   : (1, 1, TILE_B)    f32   -- lane-dense row of per-state values
    k1 = wslab_ref[_K1_R0:_K1_R1, 0:NH]          # (128, 256) bf16
    k2 = wslab_ref[_K2_R0:_K2_R1, 0:NH]          # (256, 256) bf16
    wv1 = wslab_ref[_WV1_R0:_WV1_R1, :]          # (256, 512) bf16
    b1 = pslab_ref[0:1, 0:NH]                    # (1, 256) f32 (b1 tiled over nodes)
    b2 = pslab_ref[1:2, 0:NH]                    # (1, 256) f32
    bv1 = pslab_ref[2:3, :]                      # (1, 512) f32
    wv2t = pslab_ref[3:4, :]                     # (1, 512) f32 (lane-dense wv2 row)
    bv2 = pslab_ref[4:5, 0:1]                    # (1, 1)   f32

    xb = x_ref[...].astype(jnp.bfloat16)         # (TILE_B, 128)

    # GCN layer 1: relu(A_hat(X W1) + b1)  ==  relu(Xf @ K1 + b1_tiled)   (one MXU dot)
    h = jnp.dot(xb, k1, preferred_element_type=jnp.float32) + b1
    h = jnp.maximum(h, 0.0)
    # GCN layer 2: relu(A_hat(H W2) + b2)  ==  relu(Hf @ K2 + b2_tiled)
    h = jnp.dot(h.astype(jnp.bfloat16), k2, preferred_element_type=jnp.float32) + b2
    h = jnp.maximum(h, 0.0)                      # (TILE_B, 256) == torch .view(B,-1) order

    # Value head layer 1: (TILE_B,256)x(256,512) MXU dot, bf16 weights, f32 accumulate.
    v = jnp.dot(h.astype(jnp.bfloat16), wv1, preferred_element_type=jnp.float32) + bv1
    v = jnp.maximum(v, 0.0)                      # (TILE_B, 512)

    # Value head layer 2 (Linear 512->1): VPU multiply + lane reduction (no 1-col MXU dot).
    val = jnp.sum(v * wv2t, axis=-1, keepdims=True) + bv2          # (TILE_B, 1)
    out_ref[...] = val.reshape(1, 1, out_ref.shape[-1])


def model_critic_forward(x, wslab, pslab):
    """x: (S, N, F_IN) f32, packed weight slabs -> (S, 1) f32."""
    s = x.shape[0]
    assert s % TILE_B == 0, "pad the state batch to a multiple of TILE_B"
    x2d = x.reshape(s, NF)                        # layout plumbing outside the kernel
    nt = s // TILE_B

    flops = nt * (2 * TILE_B * NF * NH            # Xf @ K1
                  + 2 * TILE_B * NH * NH          # Hf @ K2
                  + 2 * TILE_B * NH * VAL_HID     # flat @ Wv1
                  + 2 * TILE_B * VAL_HID)         # v * wv2 + reduce
    bytes_accessed = int(x2d.size * 4 + wslab.size * 2 + pslab.size * 4 + s * 4)

    out3 = pl.pallas_call(
        _critic_kernel,
        out_shape=jax.ShapeDtypeStruct((nt, 1, TILE_B), jnp.float32),
        grid=(nt,),
        in_specs=[
            pl.BlockSpec((TILE_B, NF), lambda i: (i, 0)),        # advances with the grid
            pl.BlockSpec(wslab.shape, lambda i: (0, 0)),         # resident: DMA'd once
            pl.BlockSpec(pslab.shape, lambda i: (0, 0)),         # resident: DMA'd once
        ],
        out_specs=pl.BlockSpec((1, 1, TILE_B), lambda i: (i, 0, 0)),
        compiler_params=pltpu.CompilerParams(dimension_semantics=("parallel",)),
        cost_estimate=pl.CostEstimate(flops=int(flops), transcendentals=0,
                                      bytes_accessed=bytes_accessed),
    )(x2d, wslab, pslab)
    return out3.reshape(s, 1)


# ------------------------------------ glue / setup ----------------------------------------
def build_gcn_adj(edge_index, num_nodes):
    """Dense D^{-1/2}(A+I)D^{-1/2} matching PyG GCNConv (add_self_loops, normalize).

    Note: assignment dedups duplicate edges (differs from PyG scatter-add on duplicates)."""
    src, dst = edge_index[0], edge_index[1]
    adj = np.zeros((num_nodes, num_nodes), np.float32)
    adj[dst, src] = 1.0
    idx = np.arange(num_nodes)
    adj[idx, idx] = 1.0
    deg = adj.sum(axis=1)
    dinv = 1.0 / np.sqrt(deg)
    return ((dinv[:, None] * adj) * dinv[None, :]).astype(np.float32)


def init_params(key):
    ks = jax.random.split(key, 8)
    s = 0.1

    def q(a):  # snap to bf16-representable f32 values (declared weight quantization)
        return a.astype(jnp.bfloat16).astype(jnp.float32)

    return {
        "w1": q(s * jax.random.normal(ks[0], (F_IN, HID), jnp.float32)),
        "b1": q(s * jax.random.normal(ks[1], (HID,), jnp.float32)),
        "w2": q(s * jax.random.normal(ks[2], (HID, HID), jnp.float32)),
        "b2": q(s * jax.random.normal(ks[3], (HID,), jnp.float32)),
        "wv1": q(s * jax.random.normal(ks[4], (NH, VAL_HID), jnp.float32)),
        "bv1": q(s * jax.random.normal(ks[5], (VAL_HID,), jnp.float32)),
        "wv2": q(s * jax.random.normal(ks[6], (VAL_HID,), jnp.float32)),
        "bv2": q(s * jax.random.normal(ks[7], (), jnp.float32)),
    }


def pack_params(a_hat_np, p):
    """Fold A_hat into the GCN weights (kron) and pack everything into 2 slabs (2 DMAs)."""
    w1 = np.asarray(p["w1"], np.float32)
    w2 = np.asarray(p["w2"], np.float32)
    # A @ (X W) per state == X_flat @ kron(A^T, W) for row-major (node, feature) flattening.
    k1 = np.kron(a_hat_np.T, w1).astype(np.float32)          # (NF, NH)
    k2 = np.kron(a_hat_np.T, w2).astype(np.float32)          # (NH, NH)

    wslab = np.zeros((W_ROWS, VAL_HID), np.float32)
    wslab[_K1_R0:_K1_R1, :NH] = k1
    wslab[_K2_R0:_K2_R1, :NH] = k2
    wslab[_WV1_R0:_WV1_R1, :] = np.asarray(p["wv1"], np.float32)

    pslab = np.zeros((8, VAL_HID), np.float32)
    pslab[0, :NH] = np.tile(np.asarray(p["b1"], np.float32), N)   # b1 tiled over nodes
    pslab[1, :NH] = np.tile(np.asarray(p["b2"], np.float32), N)
    pslab[2, :] = np.asarray(p["bv1"], np.float32)
    pslab[3, :] = np.asarray(p["wv2"], np.float32)                # wv2 as lane-dense row
    pslab[4, 0] = float(p["bv2"])
    return jnp.asarray(wslab).astype(jnp.bfloat16), jnp.asarray(pslab)


def reference_forward(x, a_hat, p):
    """Pure-JAX, original-module-style f32 forward (per-state GCN, no Kronecker folding)."""
    xw = jnp.einsum("bnf,fh->bnh", x, p["w1"])
    h = jax.nn.relu(jnp.einsum("mn,bnh->bmh", a_hat, xw) + p["b1"])
    hw = jnp.einsum("bnh,hk->bnk", h, p["w2"])
    h = jax.nn.relu(jnp.einsum("mn,bnh->bmh", a_hat, hw) + p["b2"])
    flat = h.reshape(h.shape[0], -1)                              # (S, N*HID) == view(B,-1)
    v = jax.nn.relu(flat @ p["wv1"] + p["bv1"])
    return (v @ p["wv2"])[:, None] + p["bv2"]                     # (S, 1)


if __name__ == "__main__":
    key = jax.random.PRNGKey(0)
    k_x, k_p = jax.random.split(key)

    # static graph: undirected ring over N nodes (edge_index shape (2, E))
    ring = np.stack([np.arange(N), (np.arange(N) + 1) % N])
    edge_index = np.concatenate([ring, ring[::-1]], axis=1)
    a_hat_np = build_gcn_adj(edge_index, N)
    a_hat = jnp.asarray(a_hat_np)

    params = init_params(k_p)
    wslab, pslab = pack_params(a_hat_np, params)

    x = jax.random.normal(k_x, (S_TOTAL, N, F_IN), jnp.float32)
    x = x.astype(jnp.bfloat16).astype(jnp.float32)   # bf16-representable inputs (exact cast)

    out = jax.block_until_ready(model_critic_forward(x, wslab, pslab))

    with jax.default_matmul_precision("float32"):
        ref = reference_forward(x, a_hat, params)

    assert out.shape == (S_TOTAL, 1)
    diff = np.max(np.abs(np.asarray(out) - np.asarray(ref)))
    # Tolerance covers the declared bf16 weight/activation quantization (~<1% rel);
    # structural/indexing errors would produce O(0.1) discrepancies.
    assert np.allclose(np.asarray(out), np.asarray(ref), atol=2e-2, rtol=2e-2), (
        f"mismatch, max abs diff {diff}")
    print("KERNEL_OK")
</pallas_src>

<mosaic_0001>
module attributes {stable_mosaic.version = 11 : i64} {
  func.func @_critic_kernel(%arg0: i32, %arg1: memref<128x128xf32, #tpu.memory_space<vmem>>, %arg2: memref<640x512xbf16, #tpu.memory_space<vmem>>, %arg3: memref<8x512xf32, #tpu.memory_space<vmem>>, %arg4: memref<1x1x128xf32, #tpu.memory_space<vmem>>) attributes {dimension_semantics = [#tpu.dimension_semantics<parallel>], iteration_bounds = array<i64: 2>, scalar_prefetch = 0 : i64, scratch_operands = 0 : i64, tpu.core_type = #tpu.core_type<tc>, window_params = [{transform_indices = @transform_0, window_bounds = array<i64: 128, 128>}, {pipeline_mode = #tpu.pipeline_mode<synchronous>, transform_indices = @transform_1, window_bounds = array<i64: 640, 512>}, {pipeline_mode = #tpu.pipeline_mode<synchronous>, transform_indices = @transform_2, window_bounds = array<i64: 8, 512>}, {transform_indices = @transform_3, window_bounds = array<i64: 1, 1, 128>}]} {
    %c0 = arith.constant 0 : index
    %c0_0 = arith.constant 0 : index
    %0 = vector.load %arg2[%c0, %c0_0] : memref<640x512xbf16, #tpu.memory_space<vmem>>, vector<128x256xbf16>
    %c128 = arith.constant 128 : index
    %c0_1 = arith.constant 0 : index
    %1 = vector.load %arg2[%c128, %c0_1] : memref<640x512xbf16, #tpu.memory_space<vmem>>, vector<256x256xbf16>
    %c384 = arith.constant 384 : index
    %c0_2 = arith.constant 0 : index
    %2 = vector.load %arg2[%c384, %c0_2] : memref<640x512xbf16, #tpu.memory_space<vmem>>, vector<256x512xbf16>
    %c0_3 = arith.constant 0 : index
    %c0_4 = arith.constant 0 : index
    %3 = vector.load %arg3[%c0_3, %c0_4] : memref<8x512xf32, #tpu.memory_space<vmem>>, vector<1x256xf32>
    %c1 = arith.constant 1 : index
    %c0_5 = arith.constant 0 : index
    %4 = vector.load %arg3[%c1, %c0_5] : memref<8x512xf32, #tpu.memory_space<vmem>>, vector<1x256xf32>
    %c2 = arith.constant 2 : index
    %c0_6 = arith.constant 0 : index
    %5 = vector.load %arg3[%c2, %c0_6] : memref<8x512xf32, #tpu.memory_space<vmem>>, vector<1x512xf32>
    %c3 = arith.constant 3 : index
    %c0_7 = arith.constant 0 : index
    %6 = vector.load %arg3[%c3, %c0_7] : memref<8x512xf32, #tpu.memory_space<vmem>>, vector<1x512xf32>
    %c4 = arith.constant 4 : index
    %c0_8 = arith.constant 0 : index
    %7 = vector.load %arg3[%c4, %c0_8] : memref<8x512xf32, #tpu.memory_space<vmem>>, vector<1x1xf32>
    %c0_9 = arith.constant 0 : index
    %c0_10 = arith.constant 0 : index
    %8 = vector.load %arg1[%c0_9, %c0_10] : memref<128x128xf32, #tpu.memory_space<vmem>>, vector<128x128xf32>
    %9 = arith.truncf %8 : vector<128x128xf32> to vector<128x128xbf16>
    %cst = arith.constant dense<0.000000e+00> : vector<128x256xf32>
    %10 = tpu.matmul %9, %0, %cst {dimension_numbers = #tpu.dot_dimension_numbers<[1], [0], [0], [1], [0, 0, 1, 1], [], []>} : vector<128x128xbf16>, vector<128x256xbf16>, vector<128x256xf32> -> vector<128x256xf32>
    %11 = vector.broadcast %3 : vector<1x256xf32> to vector<128x256xf32>
    %12 = arith.addf %10, %11 : vector<128x256xf32>
    %cst_11 = arith.constant 0.000000e+00 : f32
    %13 = vector.broadcast %cst_11 : f32 to vector<128x256xf32>
    %14 = arith.maximumf %12, %13 : vector<128x256xf32>
    %15 = arith.truncf %14 : vector<128x256xf32> to vector<128x256xbf16>
    %cst_12 = arith.constant dense<0.000000e+00> : vector<128x256xf32>
    %16 = tpu.matmul %15, %1, %cst_12 {dimension_numbers = #tpu.dot_dimension_numbers<[1], [0], [0], [1], [0, 0, 1, 1], [], []>} : vector<128x256xbf16>, vector<256x256xbf16>, vector<128x256xf32> -> vector<128x256xf32>
    %17 = vector.broadcast %4 : vector<1x256xf32> to vector<128x256xf32>
    %18 = arith.addf %16, %17 : vector<128x256xf32>
    %cst_13 = arith.constant 0.000000e+00 : f32
    %19 = vector.broadcast %cst_13 : f32 to vector<128x256xf32>
    %20 = arith.maximumf %18, %19 : vector<128x256xf32>
    %21 = arith.truncf %20 : vector<128x256xf32> to vector<128x256xbf16>
    %cst_14 = arith.constant dense<0.000000e+00> : vector<128x512xf32>
    %22 = tpu.matmul %21, %2, %cst_14 {dimension_numbers = #tpu.dot_dimension_numbers<[1], [0], [0], [1], [0, 0, 1, 1], [], []>} : vector<128x256xbf16>, vector<256x512xbf16>, vector<128x512xf32> -> vector<128x512xf32>
    %23 = vector.broadcast %5 : vector<1x512xf32> to vector<128x512xf32>
    %24 = arith.addf %22, %23 : vector<128x512xf32>
    %cst_15 = arith.constant 0.000000e+00 : f32
    %25 = vector.broadcast %cst_15 : f32 to vector<128x512xf32>
    %26 = arith.maximumf %24, %25 : vector<128x512xf32>
    %27 = vector.broadcast %6 : vector<1x512xf32> to vector<128x512xf32>
    %28 = arith.mulf %26, %27 : vector<128x512xf32>
    %cst_16 = arith.constant dense<0.000000e+00> : vector<128xf32>
    %29 = vector.multi_reduction <add>, %28, %cst_16 [1] : vector<128x512xf32> to vector<128xf32>
    %30 = vector.shape_cast %29 : vector<128xf32> to vector<128x1xf32>
    %31 = vector.broadcast %7 : vector<1x1xf32> to vector<128x1xf32>
    %32 = arith.addf %30, %31 : vector<128x1xf32>
    %33 = vector.shape_cast %32 : vector<128x1xf32> to vector<1x1x128xf32>
    %c0_17 = arith.constant 0 : index
    %c0_18 = arith.constant 0 : index
    %c0_19 = arith.constant 0 : index
    %34 = vector.load %arg4[%c0_17, %c0_18, %c0_19] : memref<1x1x128xf32, #tpu.memory_space<vmem>>, vector<1x1x128xf32>
    tpu.vector_store %arg4[%c0_17, %c0_18, %c0_19], %33 {strides = array<i32>} : memref<1x1x128xf32, #tpu.memory_space<vmem>>, vector<1x1x128xf32>,
    return
  }
  func.func @transform_0(%arg0: i32) -> (i32, i32) {
    %c0_i32 = arith.constant 0 : i32
    %c0_i32_0 = arith.constant 0 : i32
    return %arg0, %c0_i32 : i32, i32
  }
  func.func @transform_1(%arg0: i32) -> (i32, i32) {
    %c0_i32 = arith.constant 0 : i32
    %c0_i32_0 = arith.constant 0 : i32
    %c0_i32_1 = arith.constant 0 : i32
    return %c0_i32, %c0_i32_0 : i32, i32
  }
  func.func @transform_2(%arg0: i32) -> (i32, i32) {
    %c0_i32 = arith.constant 0 : i32
    %c0_i32_0 = arith.constant 0 : i32
    %c0_i32_1 = arith.constant 0 : i32
    return %c0_i32, %c0_i32_0 : i32, i32
  }
  func.func @transform_3(%arg0: i32) -> (i32, i32, i32) {
    %c0_i32 = arith.constant 0 : i32
    %c0_i32_0 = arith.constant 0 : i32
    %c0_i32_1 = arith.constant 0 : i32
    return %arg0, %c0_i32, %c0_i32_0 : i32, i32, i32
  }
}

</mosaic_0001>

<bundles_post_ra>
// kernel: tpu_custom_call.1
= control target key start
LH: loop header
LB: loop body
LE: loop exit
PB: predicated region body
PF: predicated region fallthrough
CT: control target
= control target key end

     0   :  { %8 = vsyncpa [#allocation3], 0  ;;  %s3592_s0 = inlined_call_operand.hbm [shape: f32[256,128], index: 0, kind: input, shape index: {}]   ;;  %s3593_s1 = inlined_call_operand.hbm [shape: bf16[640,512], index: 1, kind: input, shape index: {}]   ;;  %s3594_s2 = inlined_call_operand.hbm [shape: f32[8,512], index: 2, kind: input, shape index: {}]   ;;  %s3595_s3 = inlined_call_operand.hbm [shape: f32[2,1,128], index: 3, kind: output, shape index: {}]  }
   0x1   :  { %10 = vsyncpa [#allocation3 + $0x1], 0 }
   0x2   :  { %11 = vsyncpa [#allocation6], 0 }
   0x3   :  { %12 = vsyncpa [#allocation4], 0 }
   0x4   :  { %14 = vsyncpa [#allocation4 + $0x1], 0  ;;  %s3042_s12 = smov 0   ;;  %s3044_s13 = smov 0  }
   0x5   :  { %s3046_s14 = smov 0   ;;  %s3048_s15 = smov 0  }
   0x6 LB: > { %s3063_s16 = sadd.s32 4294967295, %s3013_s15   ;;  %s2187_s17 = sadd.s32 4294967294, %s3013_s15   ;;  %s3013_s15 = sphi %s3048_s15, %s3605_s15   ;;  %s3009_s14 = sphi %s3046_s14, %s3604_s14   ;;  %s3005_s13 = sphi %s3044_s13, %s3603_s13   ;;  %s3001_s12 = sphi %s3042_s12, %s3602_s12  }
   0x7   : > { %p40_p0 = scmp.ne.s32.totalorder %s3005_s13, %s3001_s12  ;;  %p41_p1 = scmp.eq.s32.totalorder %s3063_s16, 0 }
   0x8   : > { %p106_p2 = scmp.eq.s32.totalorder %s3063_s16, 1  ;;  %p112_p3 = scmp.eq.s32.totalorder %s2187_s17, 1 }
   0x9   : > { %p3072_p4 = por %p41_p1, %p40_p0  ;;  %p2188_p5 = scmp.ge.s32.totalorder %s3013_s15, 1 }
   0xa   : > { %p3077_p6 = por %p112_p3, %p40_p0  ;;  %p119_p7 = scmp.lt.s32.totalorder %s3013_s15, 3 }
   0xb   : > { %s130_s22 = sshll.u32 %s3593_s1, 4  ;;  %s3015_s24 = smov [#allocation5]   ;;  %s131_s22 = int_to_ptr.hbm [resolvable:$true] %s130_s22 }
   0xc   : > { %p3085_p8 = pnand %p2188_p5, %p119_p7  ;;  %s132_s25 = sshll.u32 %s3015_s24, 4  ;;  %s133_s25 = int_to_ptr.vmem [resolvable:$true] %s132_s25 }
   0xd   : > { %s145_s28 = sshll.u32 %s3594_s2, 4  ;;  %s3016_s29 = smov 256   ;;  %s146_s28 = int_to_ptr.hbm [resolvable:$true] %s145_s28 }
   0xe   : > { %p2790_p9 = pneg %p3085_p8  ;;  %s3017_s30 = smov 16  }
   0xf   : > { %s3018_s4 = smov [#allocation7]   ;;  %s3098_s6 = sadd.s32 1, %s3013_s15  }
  0x10   : > { %p2791_p10 = pnand %p2790_p9, %p41_p1  ;;  %s147_s5 = sshll.u32 %s3018_s4, 4  ;;  %s148_s5 = int_to_ptr.vmem [resolvable:$true] %s147_s5 }
  0x11   : > { %s27_s7 = sadd.s32 1, %s3009_s14  ;;  %s24_s8 = ssub.s32 %s3013_s15, %s3098_s6 }
  0x12   : > { %2793 = dma.hbm_to_vmem [thread:$0]  (!%p2791_p10), %s131_s22, 20480, %s133_s25, [#allocation6], %s3016_s29, %s3016_s29, %s3017_s30  }
  0x13   : > { %2796 = dma.hbm_to_vmem [thread:$0]  (!%p2791_p10), %s146_s28, 512, %s148_s5, [#allocation6]  }
  0x14   : > { %p34_p12 = scmp.ne.s32.totalorder %s3009_s14, %s3005_s13  ;;  %p25_p13 = scmp.eq.s32.totalorder %s24_s8, 0 }
  0x15   : > { %p35_p0 = scmp.eq.s32.totalorder %s3013_s15, 0  ;;  %p2807_p5 = scmp.lt.s32.totalorder %s3013_s15, 2 }
  0x16   : > { %p3108_p3 = por %p106_p2, %p34_p12  ;;  %s158_s11 = sand.u32 1, %s3009_s14  }
  0x17   : > { %s3114_s10 = scalar_select %p25_p13, %s3009_s14, %s27_s7  }
  0x18   : > { %p36_p7 = por %p35_p0, %p34_p12  ;;  %s2192_s17 = sshll.u32 %s158_s11, 7 }
  0x19   : > { %s2649_s20 = sshll.u32 %s3013_s15, 7  ;;  %s162_s25 = scalar_lea.vmem [#allocation2], %s2192_s17 }
  0x1a   : > { %s167_s24 = scalar_lea.hbm %s3592_s0, %s2649_s20  ;;  %s170_s26 = sshll.u32 %s162_s25, 4  ;;  %s171_s26 = int_to_ptr.vmem [resolvable:$true] %s170_s26 }
  0x1b   : > { %s168_s27 = sshll.u32 %s167_s24, 4  ;;  %p3121_p2 = pnand %p2807_p5, %p36_p7  ;;  %s169_s27 = int_to_ptr.hbm [resolvable:$true] %s168_s27 }
  0x1c   : > { %s159_s29 = scalar_lea.sflag [#allocation3], %s158_s11  ;;  %s2913_s30 = sshra.s32 %s169_s27, 4  ;;  %s2914_s30 = int_to_ptr.hbm [resolvable:$true] %s2913_s30 }
  0x1d   : > { %s2915_s4 = scalar_lea.hbm %s2914_s30, 128  ;;  %p2917_p10 = pneg %p3121_p2 }
  0x1e   : > { %p2916_p9 = scmp.ne.s32.totalorder %s2914_s30, %s2915_s4  ;;  %s2920_s8 = scalar_lea.hbm %s3592_s0, 256 }
  0x1f   : > { %p2921_p0 = scmp.lt.s32.totalorder %s2914_s30, %s3592_s0  ;;  %p2922_p5 = scmp.lt.s32.totalorder %s2920_s8, %s2915_s4 }
  0x20   : > { %p2918_p12 = pnand %p2917_p10, %p2916_p9 }
  0x21   : > { %p2923_p7 = por %p2922_p5, %p2921_p0 }
  0x22   : > { %p2919_p13 = pneg %p2918_p12 }
  0x24   : > { %p2924_p11 = pnand %p2923_p7, %p2919_p13 }
  0x26   : > { %2927 = shalt.err (!%p2924_p11)
}
  0x27   : > { %s3019_s11 = smov 128   ;;  %s3020_s21 = smov 8  }
  0x28   : > { %2800 = dma.hbm_to_vmem [thread:$0]  (!%p3121_p2), %s169_s27, 2048, %s171_s26, %s159_s29, %s3019_s11, %s3019_s11, %s3020_s21  }
  0x29   : > { %182 = sbr.rel (%p3085_p8) target bundleno = 1002 (0x3ea), region = 32  ;;  %s3138_s22 = sand.u32 (!%p3085_p8), 1, %s3005_s13  }
  0x2a   : > { %s2196_s24 = sshll.u32 (!%p3085_p8), %s3138_s22, 7  ;;  %s185_s25 = scalar_lea.sflag (!%p3085_p8), [#allocation3], %s3138_s22 }
  0x2b   : > { %s3142_s30 = scalar_lea.vmem (!%p3085_p8), [#allocation2], %s2196_s24 }
  0x2e   : > { %2988 = dma.done.wait (%p3072_p4), %s185_s25, 2048  }
  0x2f   : > { %2990 = vsyncadd (%p3072_p4), %s185_s25, 4294965248 }
  0x30   : > { %2992 = dma.done.wait (%p41_p1), [#allocation6], 20992  }
  0x31   : > { %2994 = vsyncadd (%p41_p1), [#allocation6], 4294946304  ;;  %v2257_v0 = vld [vmem:[#allocation5 + $0xe0] sm:$0xf]  ;;  %v2665_v1 = vld [vmem:[#allocation5 + $0xec] sm:$0xf0]  ;;  %s2098_s26 = scalar_lea.hbm %s3595_s3, %s3063_s16 }
  0x32   : > { %v2664_v2 = vld [vmem:[#allocation5 + $0xe4] sm:$0xf]  ;;  %v2258_v3 = vor.u32 %v2665_v1, %v2257_v0  ;;  %v2259_v4 = vld [vmem:[#allocation5 + $0xf0] sm:$0xf0]  ;;  %v2249_v5 = vld [vmem:[#allocation5 + $0xc0] sm:$0xf] }
  0x33   : > { %v2663_v6 = vld [vmem:[#allocation5 + $0xcc] sm:$0xf0]  ;;  %v2262_v7 = vor.u32 %v2664_v2, %v2259_v4  ;;  %v2662_v8 = vld [vmem:[#allocation5 + $0xc4] sm:$0xf]  ;;  %v2251_v9 = vld [vmem:[#allocation5 + $0xd0] sm:$0xf0] }
  0x34   : > { %451 = vmatpush.bf16.msra.mxu0 %v2258_v3  ;;  %v2250_v10 = vor.u32 %v2663_v6, %v2249_v5  ;;  %2762 = vmatpush.bf16.msra.mxu2 %v2258_v3  ;;  %v2254_v11 = vor.u32 %v2662_v8, %v2251_v9  ;;  %v2241_v12 = vld [vmem:[#allocation5 + $0xa0] sm:$0xf]  ;;  %v2661_v13 = vld [vmem:[#allocation5 + $0xac] sm:$0xf0]  ;;  %v2660_v14 = vld [vmem:[#allocation5 + $0xa4] sm:$0xf] }
  0x35   : > { %500 = vmatpush.bf16.msra.mxu1 %v2262_v7  ;;  %2770 = vmatpush.bf16.msra.mxu3 %v2262_v7  ;;  %v2243_v15 = vld [vmem:[#allocation5 + $0xb0] sm:$0xf0]  ;;  %v2242_v16 = vor.u32 %v2661_v13, %v2241_v12  ;;  %v2233_v18 = vld [vmem:[#allocation5 + $0x80] sm:$0xf]  ;;  %v2659_v19 = vld [vmem:[#allocation5 + $0x8c] sm:$0xf0] }
  0x36   : > { %v2246_v17 = vor.u32 %v2660_v14, %v2243_v15  ;;  %v2658_v20 = vld [vmem:[#allocation5 + $0x84] sm:$0xf]  ;;  %v2235_v21 = vld [vmem:[#allocation5 + $0x90] sm:$0xf0]  ;;  %v2234_v22 = vor.u32 %v2659_v19, %v2233_v18  ;;  %v2225_v24 = vld [vmem:[#allocation5 + $0x60] sm:$0xf] }
  0x37   : > { %v2238_v23 = vor.u32 %v2658_v20, %v2235_v21  ;;  %v2657_v25 = vld [vmem:[#allocation5 + $0x6c] sm:$0xf0]  ;;  %v2656_v26 = vld [vmem:[#allocation5 + $0x64] sm:$0xf]  ;;  %v2227_v27 = vld [vmem:[#allocation5 + $0x70] sm:$0xf0] }
  0x38   : > { %452 = vmatpush.bf16.msra.mxu0 %v2250_v10  ;;  %2763 = vmatpush.bf16.msra.mxu2 %v2250_v10  ;;  %v2226_v28 = vor.u32 %v2657_v25, %v2225_v24  ;;  %v2230_v29 = vor.u32 %v2656_v26, %v2227_v27  ;;  %v2217_v30 = vld [vmem:[#allocation5 + $0x40] sm:$0xf]  ;;  %v2655_v31 = vld [vmem:[#allocation5 + $0x4c] sm:$0xf0]  ;;  %v2654_v32 = vld [vmem:[#allocation5 + $0x44] sm:$0xf] }
  0x39   : > { %501 = vmatpush.bf16.msra.mxu1 %v2254_v11  ;;  %2771 = vmatpush.bf16.msra.mxu3 %v2254_v11  ;;  %v2219_v33 = vld [vmem:[#allocation5 + $0x50] sm:$0xf0]  ;;  %v2218_v34 = vor.u32 %v2655_v31, %v2217_v30  ;;  %v2209_v36 = vld [vmem:[#allocation5 + $0x20] sm:$0xf]  ;;  %v2653_v37 = vld [vmem:[#allocation5 + $0x2c] sm:$0xf0] }
  0x3a   : > { %v2222_v35 = vor.u32 %v2654_v32, %v2219_v33  ;;  %v2652_v38 = vld [vmem:[#allocation5 + $0x24] sm:$0xf]  ;;  %v2211_v39 = vld [vmem:[#allocation5 + $0x30] sm:$0xf0]  ;;  %v2210_v40 = vor.u32 %v2653_v37, %v2209_v36  ;;  %v2201_v42 = vld [vmem:[#allocation5] sm:$0xf] }
  0x3b   : > { %v2214_v41 = vor.u32 %v2652_v38, %v2211_v39  ;;  %v2651_v43 = vld [vmem:[#allocation5 + $0xc] sm:$0xf0]  ;;  %v2650_v44 = vld [vmem:[#allocation5 + $0x4] sm:$0xf]  ;;  %v2203_v45 = vld [vmem:[#allocation5 + $0x10] sm:$0xf0] }
  0x3c   : > { %453 = vmatpush.bf16.msra.mxu0 %v2242_v16  ;;  %2764 = vmatpush.bf16.msra.mxu2 %v2242_v16  ;;  %v2202_v46 = vor.u32 %v2651_v43, %v2201_v42  ;;  %v342_v47 = vld [vmem:[%s3142_s30] sm:$0xff]  ;;  %v343_v48 = vld [vmem:[%s3142_s30 + $0x8] sm:$0xff]  ;;  %v2206_v49 = vor.u32 %v2650_v44, %v2203_v45  ;;  %v344_v51 = vld [vmem:[%s3142_s30 + $0x10] sm:$0xff]  ;;  %vm2029_vm0 = vcmask 130112   ;;  %vm2033_vm1 = vcmask 195712   ;;  %s220_s27 = scalar_lea.vmem [#allocation8], %s3138_s22 }
  0x3d   : > { %502 = vmatpush.bf16.msra.mxu1 %v2246_v17  ;;  %2772 = vmatpush.bf16.msra.mxu3 %v2246_v17  ;;  %v358_v50 = vpack.c.bf16 %v343_v48, %v342_v47  ;;  %v345_v52 = vld [vmem:[%s3142_s30 + $0x18] sm:$0xff]  ;;  %v350_v54 = vld [vmem:[%s3142_s30 + $0x40] sm:$0xff]  ;;  %v351_v55 = vld [vmem:[%s3142_s30 + $0x48] sm:$0xff]  ;;  %vm2037_vm2 = vcmask 261312   ;;  %vm2041_vm3 = vcmask 326912   ;;  %vm2045_vm4 = vcmask 392512  }
  0x3e   : > { %v359_v53 = vpack.c.bf16 %v345_v52, %v344_v51  ;;  %v362_v56 = vpack.c.bf16 %v351_v55, %v350_v54  ;;  %v2321_v57 = vld [vmem:[#allocation5 + $0x1e0] sm:$0xf]  ;;  %v2681_v58 = vld [vmem:[#allocation5 + $0x1ec] sm:$0xf0]  ;;  %v2680_v1 = vld [vmem:[#allocation5 + $0x1e4] sm:$0xf] }
  0x3f   : > { %v2385_v59 = vld [vmem:[#allocation5 + $0x2e0] sm:$0xf]  ;;  %v2697_v60 = vld [vmem:[#allocation5 + $0x2ec] sm:$0xf0]  ;;  %v2322_v61 = vor.u32 %v2681_v58, %v2321_v57  ;;  %v2323_v2 = vld [vmem:[#allocation5 + $0x1f0] sm:$0xf0] }
  0x40   : > { %454 = vmatpush.bf16.msra.mxu0 %v2234_v22  ;;  %2765 = vmatpush.bf16.msra.mxu2 %v2234_v22  ;;  %v2386_v62 = vor.u32 %v2697_v60, %v2385_v59  ;;  %v2313_v63 = vld [vmem:[#allocation5 + $0x1c0] sm:$0xf]  ;;  %v2679_v0 = vld [vmem:[#allocation5 + $0x1cc] sm:$0xf0]  ;;  %v2326_v4 = vor.u32 %v2680_v1, %v2323_v2  ;;  %v2696_v7 = vld [vmem:[#allocation5 + $0x2e4] sm:$0xf] }
  0x41   : > { %503 = vmatpush.bf16.msra.mxu1 %v2238_v23  ;;  %2773 = vmatpush.bf16.msra.mxu3 %v2238_v23  ;;  %v2314_v3 = vor.u32 %v2679_v0, %v2313_v63  ;;  %v2377_v5 = vld [vmem:[#allocation5 + $0x2c0] sm:$0xf]  ;;  %v2695_v6 = vld [vmem:[#allocation5 + $0x2cc] sm:$0xf0]  ;;  %v2387_v9 = vld [vmem:[#allocation5 + $0x2f0] sm:$0xf0] }
  0x42   : > { %v2378_v8 = vor.u32 %v2695_v6, %v2377_v5  ;;  %v2305_v10 = vld [vmem:[#allocation5 + $0x1a0] sm:$0xf]  ;;  %v2677_v11 = vld [vmem:[#allocation5 + $0x1ac] sm:$0xf0]  ;;  %v2390_v12 = vor.u32 %v2696_v7, %v2387_v9  ;;  %v2678_v13 = vld [vmem:[#allocation5 + $0x1c4] sm:$0xf] }
  0x43   : > { %v2315_v14 = vld [vmem:[#allocation5 + $0x1d0] sm:$0xf0]  ;;  %v2369_v15 = vld [vmem:[#allocation5 + $0x2a0] sm:$0xf]  ;;  %v2693_v17 = vld [vmem:[#allocation5 + $0x2ac] sm:$0xf0]  ;;  %v2306_v22 = vor.u32 %v2677_v11, %v2305_v10 }
  0x44   : > { %455 = vmatpush.bf16.msra.mxu0 %v2226_v28  ;;  %2766 = vmatpush.bf16.msra.mxu2 %v2226_v28  ;;  %v2318_v16 = vor.u32 %v2678_v13, %v2315_v14  ;;  %v2694_v18 = vld [vmem:[#allocation5 + $0x2c4] sm:$0xf]  ;;  %v2379_v19 = vld [vmem:[#allocation5 + $0x2d0] sm:$0xf0]  ;;  %v347_v21 = vld [vmem:[%s3142_s30 + $0x28] sm:$0xff]  ;;  %v2370_v23 = vor.u32 %v2693_v17, %v2369_v15  ;;  %vm2049_vm5 = vcmask 458112  }
  0x45   : > { %504 = vmatpush.bf16.msra.mxu1 %v2230_v29  ;;  %2774 = vmatpush.bf16.msra.mxu3 %v2230_v29  ;;  %v346_v20 = vld [vmem:[%s3142_s30 + $0x20] sm:$0xff]  ;;  %v2382_v24 = vor.u32 %v2694_v18, %v2379_v19  ;;  %v352_v26 = vld [vmem:[%s3142_s30 + $0x50] sm:$0xff]  ;;  %v353_v27 = vld [vmem:[%s3142_s30 + $0x58] sm:$0xff]  ;;  %vm2053_vm6 = vcmask 523712   ;;  %vm2057_vm7 = vcmask 589312   ;;  %vm2061_vm8 = vcmask 654912  }
  0x46   : > { %v360_v25 = vpack.c.bf16 %v347_v21, %v346_v20  ;;  %v363_v28 = vpack.c.bf16 %v353_v27, %v352_v26  ;;  %v2297_v29 = vld [vmem:[#allocation5 + $0x180] sm:$0xf]  ;;  %v2675_v30 = vld [vmem:[#allocation5 + $0x18c] sm:$0xf0]  ;;  %v2676_v31 = vld [vmem:[#allocation5 + $0x1a4] sm:$0xf] }
  0x47   : > { %v2298_v32 = vor.u32 %v2675_v30, %v2297_v29  ;;  %v2307_v33 = vld [vmem:[#allocation5 + $0x1b0] sm:$0xf0]  ;;  %v2692_v38 = vld [vmem:[#allocation5 + $0x2a4] sm:$0xf]  ;;  %v2673_v42 = vld [vmem:[#allocation5 + $0x16c] sm:$0xf0] }
  0x48   : > { %456 = vmatpush.bf16.msra.mxu0 %v2218_v34  ;;  %2767 = vmatpush.bf16.msra.mxu2 %v2218_v34  ;;  %v2361_v34 = vld [vmem:[#allocation5 + $0x280] sm:$0xf]  ;;  %v2310_v36 = vor.u32 %v2676_v31, %v2307_v33  ;;  %v2371_v39 = vld [vmem:[#allocation5 + $0x2b0] sm:$0xf0]  ;;  %v2674_v43 = vld [vmem:[#allocation5 + $0x184] sm:$0xf] }
  0x49   : > { %505 = vmatpush.bf16.msra.mxu1 %v2222_v35  ;;  %2775 = vmatpush.bf16.msra.mxu3 %v2222_v35  ;;  %v2691_v35 = vld [vmem:[#allocation5 + $0x28c] sm:$0xf0]  ;;  %v2299_v44 = vld [vmem:[#allocation5 + $0x190] sm:$0xf0]  ;;  %v2690_v51 = vld [vmem:[#allocation5 + $0x284] sm:$0xf] }
  0x4a   : > { %v2362_v37 = vor.u32 %v2691_v35, %v2361_v34  ;;  %v348_v45 = vld [vmem:[%s3142_s30 + $0x30] sm:$0xff]  ;;  %v2302_v48 = vor.u32 %v2674_v43, %v2299_v44  ;;  %v2281_v54 = vld [vmem:[#allocation5 + $0x140] sm:$0xf]  ;;  %v2672_v57 = vld [vmem:[#allocation5 + $0x164] sm:$0xf]  ;;  %vm2065_vm9 = vcmask 720512  }
  0x4b   : > { %v2671_v55 = vld [vmem:[#allocation5 + $0x14c] sm:$0xf0]  ;;  %v2291_v58 = vld [vmem:[#allocation5 + $0x170] sm:$0xf0]  ;;  %v2345_v59 = vld [vmem:[#allocation5 + $0x240] sm:$0xf] }
  0x4c   : > { %457 = vmatpush.bf16.msra.mxu0 %v2210_v40  ;;  %2768 = vmatpush.bf16.msra.mxu2 %v2210_v40  ;;  %v2289_v40 = vld [vmem:[#allocation5 + $0x160] sm:$0xf]  ;;  %v2282_v60 = vor.u32 %v2671_v55, %v2281_v54  ;;  %v2355_v63 = vld [vmem:[#allocation5 + $0x270] sm:$0xf0]  ;;  %v2294_v0 = vor.u32 %v2672_v57, %v2291_v58  ;;  %v355_v6 = vld [vmem:[%s3142_s30 + $0x68] sm:$0xff]  ;;  %vm2069_vm10 = vcmask 786112  }
  0x4d   : > { %506 = vmatpush.bf16.msra.mxu1 %v2214_v41  ;;  %2776 = vmatpush.bf16.msra.mxu3 %v2214_v41  ;;  %v2374_v41 = vor.u32 %v2692_v38, %v2371_v39  ;;  %v2290_v47 = vor.u32 %v2673_v42, %v2289_v40  ;;  %v2273_v2 = vld [vmem:[#allocation5 + $0x120] sm:$0xf]  ;;  %v2283_v9 = vld [vmem:[#allocation5 + $0x150] sm:$0xf0]  ;;  %v357_v14 = vld [vmem:[%s3142_s30 + $0x78] sm:$0xff]  ;;  %vm2073_vm11 = vcmask 851712  }
  0x4e   : > { %v354_v5 = vld [vmem:[%s3142_s30 + $0x60] sm:$0xff]  ;;  %v356_v13 = vld [vmem:[%s3142_s30 + $0x70] sm:$0xff]  ;;  %vm2077_vm12 = vcmask 917312   ;;  %vm2081_vm13 = vcmask 982912   ;;  %s2100_s28 = sshll.u32 %s220_s27, 4  ;;  %s2102_s29 = sshll.u32 %s2098_s26, 4  ;;  %s2101_s28 = int_to_ptr.vmem [resolvable:$true] %s2100_s28  ;;  %s2103_s29 = int_to_ptr.hbm [resolvable:$true] %s2102_s29 }
  0x4f   : > { %v364_v11 = vpack.c.bf16 %v355_v6, %v354_v5  ;;  %v365_v15 = vpack.c.bf16 %v357_v14, %v356_v13  ;;  %v2347_v17 = vld [vmem:[#allocation5 + $0x250] sm:$0xf0]  ;;  %v2337_v19 = vld [vmem:[#allocation5 + $0x220] sm:$0xf]  ;;  %v2685_v20 = vld [vmem:[#allocation5 + $0x22c] sm:$0xf0] }
  0x50   : > { %458 = vmatpush.bf16.msra.mxu0 %v2202_v46  ;;  %2769 = vmatpush.bf16.msra.mxu2 %v2202_v46  ;;  %v349_v46 = vld [vmem:[%s3142_s30 + $0x38] sm:$0xff]  ;;  %v2265_v21 = vld [vmem:[#allocation5 + $0x100] sm:$0xf]  ;;  %v2339_v29 = vld [vmem:[#allocation5 + $0x230] sm:$0xf0]  ;;  %vm2085_vm14 = vcmask 1048512  }
  0x51   : > { %507 = vmatpush.bf16.msra.mxu1 %v2206_v49  ;;  %2777 = vmatpush.bf16.msra.mxu3 %v2206_v49  ;;  %v2353_v49 = vld [vmem:[#allocation5 + $0x260] sm:$0xf]  ;;  %v2666_v33 = vld [vmem:[#allocation5 + $0x104] sm:$0xf]  ;;  %v2267_v35 = vld [vmem:[#allocation5 + $0x110] sm:$0xf0] }
  0x52   : > { %v2329_v31 = vld [vmem:[#allocation5 + $0x200] sm:$0xf]  ;;  %v2270_v38 = vor.u32 %v2666_v33, %v2267_v35  ;;  %v2720_v33 = vld [vmem:[#allocation5 + $0x3ac] sm:$0xf0]  ;;  %s2090_s16 = scalar_lea.sflag [#allocation4], %s3138_s22  ;;  %s2957_s4 = sshra.s32 %s2103_s29, 4  ;;  %s2958_s4 = int_to_ptr.hbm [resolvable:$true] %s2957_s4 }
  0x53   : > { %459 = vmatmul.bf16.vlgmr.msra.gmra.mxu0 %v358_v50  ;;  %479 = vmatmul.bf16.vlgmr.msra.gmra.mxu2 %v362_v56  ;;  %v334_v40 = vld [vmem:[#allocation7] ss:$8 sm:$0x3]  ;;  %s2959_s5 = scalar_lea.hbm %s2958_s4, 1  ;;  %s2963_s17 = scalar_lea.hbm %s3595_s3, 2 }
  0x54   : > { %508 = vmatmul.bf16.vlgmr.msra.gmra.mxu1 %v358_v50  ;;  %528 = vmatmul.bf16.vlgmr.msra.gmra.mxu3 %v362_v56  ;;  %v2689_v50 = vld [vmem:[#allocation5 + $0x26c] sm:$0xf0]  ;;  %v3168_v43 = vperm.slane %v334_v40, 0  ;;  %v3170_v44 = vperm.slane %v334_v40, 1  ;;  %p2960_p1 = scmp.ne.s32.totalorder %s2958_s4, %s2959_s5  ;;  %p2964_p11 = scmp.lt.s32.totalorder %s2958_s4, %s3595_s3 }
  0x55   : > { %762 = vmatpush.bf16.msrb.mxu2 %v2322_v61  ;;  %811 = vmatpush.bf16.msrb.mxu3 %v2386_v62  ;;  %v2354_v52 = vor.u32 %v2689_v50, %v2353_v49  ;;  %v2687_v61 = vld [vmem:[#allocation5 + $0x24c] sm:$0xf0]  ;;  %v2688_v62 = vld [vmem:[#allocation5 + $0x264] sm:$0xf]  ;;  %p2965_p2 = scmp.lt.s32.totalorder %s2963_s17, %s2959_s5 }
  0x56   : > { %860 = vmatpush.bf16.msrb.mxu0 %v2326_v4  ;;  %909 = vmatpush.bf16.msrb.mxu1 %v2390_v12  ;;  %v2346_v1 = vor.u32 %v2687_v61, %v2345_v59  ;;  %v361_v4 = vpack.c.bf16 %v349_v46, %v348_v45  ;;  %v2358_v7 = vor.u32 %v2688_v62, %v2355_v63  ;;  %v2505_v45 = vld [vmem:[#allocation5 + $0x3e0] sm:$0xf]  ;;  %v2728_v46 = vld [vmem:[#allocation5 + $0x3ec] sm:$0xf0]  ;;  %v2726_v61 = vld [vmem:[#allocation5 + $0x3e4] sm:$0xf]  ;;  %p2961_p4 = pnand %p2960_p1, %p3108_p3 }
  0x57   : > { %v2760_v49 = vld [vmem:[#allocation5 + $0x4ec] sm:$0xf0]  ;;  %v2507_v62 = vld [vmem:[#allocation5 + $0x3f0] sm:$0xf0]  ;;  %p2966_p9 = por %p2965_p2, %p2964_p11 }
  0x58   : > { %p2962_p8 = pneg %p2961_p4 }
  0x59   : > { %763 = vmatpush.bf16.msrb.mxu2 %v2314_v3  ;;  %812 = vmatpush.bf16.msrb.mxu3 %v2378_v8  ;;  %v2669_v3 = vld [vmem:[#allocation5 + $0x12c] sm:$0xf0]  ;;  %v2670_v8 = vld [vmem:[#allocation5 + $0x144] sm:$0xf] }
  0x5a   : > { %861 = vmatpush.bf16.msrb.mxu0 %v2318_v16  ;;  %910 = vmatpush.bf16.msrb.mxu1 %v2382_v24  ;;  %v2274_v10 = vor.u32 %v2669_v3, %v2273_v2  ;;  %v2286_v12 = vor.u32 %v2670_v8, %v2283_v9  ;;  %v2686_v16 = vld [vmem:[#allocation5 + $0x244] sm:$0xf]  ;;  %v2635_v2 = vld [vmem:[#allocation5 + $0x4f0] sm:$0xf0]  ;;  %v2724_v8 = vld [vmem:[#allocation5 + $0x3cc] sm:$0xf0]  ;;  %p2967_p10 = pnand %p2966_p9, %p2962_p8 }
  0x5b   : > { %v2350_v18 = vor.u32 %v2686_v16, %v2347_v17  ;;  %v2668_v24 = vld [vmem:[#allocation5 + $0x124] sm:$0xf] }
  0x5d   : > { %764 = vmatpush.bf16.msrb.mxu2 %v2306_v22  ;;  %813 = vmatpush.bf16.msrb.mxu3 %v2370_v23  ;;  %v2338_v22 = vor.u32 %v2685_v20, %v2337_v19  ;;  %v2667_v23 = vld [vmem:[#allocation5 + $0x10c] sm:$0xf0] }
  0x5e   : > { %862 = vmatpush.bf16.msrb.mxu0 %v2310_v36  ;;  %911 = vmatpush.bf16.msrb.mxu1 %v2374_v41  ;;  %v2266_v26 = vor.u32 %v2667_v23, %v2265_v21  ;;  %v2682_v36 = vld [vmem:[#allocation5 + $0x204] sm:$0xf] }
  0x5f   : > { %v2722_v23 = vld [vmem:[#allocation5 + $0x3c4] sm:$0xf] }
  0x61   : > { %765 = vmatpush.bf16.msrb.mxu2 %v2298_v32  ;;  %814 = vmatpush.bf16.msrb.mxu3 %v2362_v37  ;;  %v2683_v32 = vld [vmem:[#allocation5 + $0x20c] sm:$0xf0]  ;;  %v2331_v37 = vld [vmem:[#allocation5 + $0x210] sm:$0xf0] }
  0x62   : > { %863 = vmatpush.bf16.msrb.mxu0 %v2302_v48  ;;  %v2330_v34 = vor.u32 %v2683_v32, %v2329_v31  ;;  %v2334_v39 = vor.u32 %v2682_v36, %v2331_v37  ;;  %v2633_v48 = vld [vmem:[#allocation5 + $0x4e0] sm:$0xf]  ;;  %v2752_v37 = vld [vmem:[#allocation5 + $0x4ac] sm:$0xf0] }
  0x63   : > { %464 = vmatmul.bf16.gmra.mxu0 %v359_v53  ;;  %484 = vmatmul.bf16.gmra.mxu2 %v363_v28  ;;  %v2634_v50 = vor.u32 %v2760_v49, %v2633_v48  ;;  %v2473_v32 = vld [vmem:[#allocation5 + $0x3a0] sm:$0xf] }
  0x64   : > { %513 = vmatmul.bf16.gmra.mxu1 %v359_v53  ;;  %533 = vmatmul.bf16.gmra.mxu3 %v363_v28  ;;  %v2363_v53 = vld [vmem:[#allocation5 + $0x290] sm:$0xf0]  ;;  %v2684_v28 = vld [vmem:[#allocation5 + $0x224] sm:$0xf]  ;;  %v2474_v36 = vor.u32 %v2720_v33, %v2473_v32 }
  0x65   : > { %v2366_v56 = vor.u32 %v2690_v51, %v2363_v53  ;;  %766 = vmatpush.bf16.msrb.mxu2 %v2290_v47  ;;  %815 = vmatpush.bf16.msrb.mxu3 %v2354_v52  ;;  %v2342_v30 = vor.u32 %v2684_v28, %v2339_v29  ;;  %v2506_v47 = vor.u32 %v2728_v46, %v2505_v45  ;;  %v2619_v28 = vld [vmem:[#allocation5 + $0x4d0] sm:$0xf0]  ;;  %v2710_v32 = vld [vmem:[#allocation5 + $0x364] sm:$0xf] }
  0x66   : > { %864 = vmatpush.bf16.msrb.mxu0 %v2294_v0  ;;  %v2510_v0 = vor.u32 %v2726_v61, %v2507_v62  ;;  %v2603_v45 = vld [vmem:[#allocation5 + $0x4b0] sm:$0xf0]  ;;  %v2457_v62 = vld [vmem:[#allocation5 + $0x380] sm:$0xf] }
  0x67   : > { %912 = vmatpush.bf16.msrb.mxu1 %v2366_v56  ;;  %v2443_v33 = vld [vmem:[#allocation5 + $0x370] sm:$0xf0] }
  0x69   : > { %767 = vmatpush.bf16.msrb.mxu2 %v2282_v60  ;;  %816 = vmatpush.bf16.msrb.mxu3 %v2346_v1  ;;  %v2758_v1 = vld [vmem:[#allocation5 + $0x4e4] sm:$0xf] }
  0x6a   : > { %865 = vmatpush.bf16.msrb.mxu0 %v2286_v12 }
  0x6b   : > { %913 = vmatpush.bf16.msrb.mxu1 %v2358_v7  ;;  %v2489_v7 = vld [vmem:[#allocation5 + $0x3c0] sm:$0xf] }
  0x6c   : > { %v2490_v9 = vor.u32 %v2724_v8, %v2489_v7  ;;  %v2746_v8 = vld [vmem:[#allocation5 + $0x484] sm:$0xf] }
  0x6d   : > { %768 = vmatpush.bf16.msrb.mxu2 %v2274_v10  ;;  %817 = vmatpush.bf16.msrb.mxu3 %v2338_v22  ;;  %v2617_v10 = vld [vmem:[#allocation5 + $0x4c0] sm:$0xf] }
  0x6f   : > { %914 = vmatpush.bf16.msrb.mxu1 %v2350_v18 }
  0x71   : > { %769 = vmatpush.bf16.msrb.mxu2 %v2266_v26  ;;  %818 = vmatpush.bf16.msrb.mxu3 %v2330_v34  ;;  %v2601_v34 = vld [vmem:[#allocation5 + $0x4a0] sm:$0xf] }
  0x72   : > { %v2602_v40 = vor.u32 %v2752_v37, %v2601_v34  ;;  %v2571_v37 = vld [vmem:[#allocation5 + $0x470] sm:$0xf0] }
  0x73   : > { %469 = vmatmul.bf16.gmra.mxu0 %v360_v25  ;;  %489 = vmatmul.bf16.gmra.mxu2 %v364_v11 }
  0x74   : > { %518 = vmatmul.bf16.gmra.mxu1 %v360_v25  ;;  %538 = vmatmul.bf16.gmra.mxu3 %v364_v11  ;;  %v2275_v25 = vld [vmem:[#allocation5 + $0x130] sm:$0xf0]  ;;  %v2756_v11 = vld [vmem:[#allocation5 + $0x4cc] sm:$0xf0] }
  0x75   : > { %v2278_v27 = vor.u32 %v2668_v24, %v2275_v25  ;;  %915 = vmatpush.bf16.msrb.mxu1 %v2342_v30  ;;  %1335 = vmatpush.bf16.msra.mxu2 %v2506_v47  ;;  %v2618_v12 = vor.u32 %v2756_v11, %v2617_v10  ;;  %v2491_v24 = vld [vmem:[#allocation5 + $0x3d0] sm:$0xf0] }
  0x76   : > { %1384 = vmatpush.bf16.msra.mxu3 %v2634_v50  ;;  %v2494_v26 = vor.u32 %v2722_v23, %v2491_v24 }
  0x77   : > { %866 = vmatpush.bf16.msrb.mxu0 %v2278_v27  ;;  %v2754_v27 = vld [vmem:[#allocation5 + $0x4c4] sm:$0xf] }
  0x78   : > { %v2622_v30 = vor.u32 %v2754_v27, %v2619_v28  ;;  %v2712_v27 = vld [vmem:[#allocation5 + $0x36c] sm:$0xf0]  ;;  %v2569_v28 = vld [vmem:[#allocation5 + $0x460] sm:$0xf] }
  0x79   : > { %916 = vmatpush.bf16.msrb.mxu1 %v2334_v39  ;;  %1336 = vmatpush.bf16.msra.mxu2 %v2490_v9  ;;  %v2475_v39 = vld [vmem:[#allocation5 + $0x3b0] sm:$0xf0] }
  0x7a   : > { %1385 = vmatpush.bf16.msra.mxu3 %v2618_v12  ;;  %v2587_v9 = vld [vmem:[#allocation5 + $0x490] sm:$0xf0] }
  0x7b   : > { %867 = vmatpush.bf16.msrb.mxu0 %v2270_v38  ;;  %v2718_v38 = vld [vmem:[#allocation5 + $0x3a4] sm:$0xf]  ;;  %v2590_v10 = vor.u32 %v2746_v8, %v2587_v9 }
  0x7d   : > { %1337 = vmatpush.bf16.msra.mxu2 %v2474_v36  ;;  %v2742_v36 = vld [vmem:[#allocation5 + $0x464] sm:$0xf] }
  0x7e   : > { %1386 = vmatpush.bf16.msra.mxu3 %v2602_v40 }
  0x7f   : > { %1433 = vmatpush.bf16.msra.mxu0 %v2510_v0  ;;  %v2585_v0 = vld [vmem:[#allocation5 + $0x480] sm:$0xf] }
  0x83   : > { %474 = vmatmul.bf16.gmra.mxu0 %v361_v4  ;;  %494 = vmatmul.bf16.gmra.mxu2 %v365_v15 }
  0x84   : > { %523 = vmatmul.bf16.gmra.mxu1 %v361_v4  ;;  %543 = vmatmul.bf16.gmra.mxu3 %v365_v15  ;;  %v2638_v4 = vor.u32 %v2758_v1, %v2635_v2 }
  0x85   : > { %1434 = vmatpush.bf16.msra.mxu0 %v2494_v26  ;;  %v2441_v26 = vld [vmem:[#allocation5 + $0x360] sm:$0xf] }
  0x86   : > { %1482 = vmatpush.bf16.msra.mxu1 %v2638_v4  ;;  %v2714_v4 = vld [vmem:[#allocation5 + $0x384] sm:$0xf] }
  0x8a   : > { %1483 = vmatpush.bf16.msra.mxu1 %v2622_v30  ;;  %v2442_v30 = vor.u32 %v2712_v27, %v2441_v26 }
  0xd0   : > { %v460_v41 = vpop.f32.mrf.mxu0 }
  0xd1   : > { %v509_v42 = vpop.f32.mrf.mxu1  ;;  %v461_v51 = vadd.f32 %v460_v41, %v3168_v43  ;;  %v2478_v41 = vor.u32 %v2718_v38, %v2475_v39  ;;  %v2574_v38 = vor.u32 %v2742_v36, %v2571_v37  ;;  %v2734_v36 = vld [vmem:[#allocation5 + $0x424] sm:$0xf]  ;;  %v2539_v37 = vld [vmem:[#allocation5 + $0x430] sm:$0xf0] }
  0xd2   : > { %v510_v52 = vadd.f32 %v509_v42, %v3170_v44  ;;  %v2750_v42 = vld [vmem:[#allocation5 + $0x4a4] sm:$0xf] }
  0xd3   : > { %v549_v57 = vmax.f32 %v461_v51, 0.0  ;;  %v2606_v46 = vor.u32 %v2750_v42, %v2603_v45  ;;  %1435 = vmatpush.bf16.msra.mxu0 %v2478_v41 }
  0xd4   : > { %v550_v59 = vmax.f32 %v510_v52, 0.0 }
  0xd5   : > { %1484 = vmatpush.bf16.msra.mxu1 %v2606_v46 }
  0xd8   : > { %v462_v53 = vpop.f32.mrf.mxu0 }
  0xd9   : > { %v463_v54 = vadd.f32 %v462_v53, %v3168_v43  ;;  %v511_v55 = vpop.f32.mrf.mxu1  ;;  %1485 = vmatpush.bf16.msra.mxu1 %v2590_v10 }
  0xda   : > { %v512_v56 = vadd.f32 %v511_v55, %v3170_v44 }
  0xdb   : > { %v551_v58 = vmax.f32 %v463_v54, 0.0 }
  0xdc   : > { %v552_v60 = vmax.f32 %v512_v56, 0.0 }
  0xdd   : > { %v581_v63 = vpack.c.bf16 %v551_v58, %v549_v57  ;;  %v480_v57 = vpop.f32.mrf.mxu2  ;;  %1486 = vmatpush.bf16.msra.mxu1 %v2574_v38 }
  0xde   : > { %v582_v3 = vpack.c.bf16 %v552_v60, %v550_v59  ;;  %v529_v59 = vpop.f32.mrf.mxu3  ;;  %v481_v39 = vadd.f32 %v480_v57, %v3168_v43  ;;  %v2740_v57 = vld [vmem:[#allocation5 + $0x44c] sm:$0xf0] }
  0xdf   : > { %770 = vmatmul.bf16.vlgmr.msrb.gmra.mxu2 %v581_v63  ;;  %868 = vmatmul.bf16.vlgmr.msrb.gmra.mxu0 %v581_v63  ;;  %v2716_v63 = vld [vmem:[#allocation5 + $0x38c] sm:$0xf0]  ;;  %v530_v41 = vadd.f32 %v529_v59, %v3170_v44  ;;  %v2427_v59 = vld [vmem:[#allocation5 + $0x350] sm:$0xf0] }
  0xe0   : > { %819 = vmatmul.bf16.vlgmr.msrb.gmra.mxu3 %v582_v3  ;;  %917 = vmatmul.bf16.vlgmr.msrb.gmra.mxu1 %v582_v3  ;;  %v465_v5 = vpop.f32.mrf.mxu0  ;;  %v2458_v2 = vor.u32 %v2716_v63, %v2457_v62  ;;  %v2748_v3 = vld [vmem:[#allocation5 + $0x48c] sm:$0xf0]  ;;  %v565_v45 = vmax.f32 %v481_v39, 0.0  ;;  %v2738_v62 = vld [vmem:[#allocation5 + $0x444] sm:$0xf]  ;;  %v2542_v39 = vor.u32 %v2734_v36, %v2539_v37 }
  0xe1   : > { %v514_v6 = vpop.f32.mrf.mxu1  ;;  %v466_v13 = vadd.f32 %v465_v5, %v3168_v43  ;;  %v2459_v5 = vld [vmem:[#allocation5 + $0x390] sm:$0xf0]  ;;  %v2757_v36 = vld [vmem:[#allocation5 + $0x4d4] sm:$0xf0] }
  0xe2   : > { %v515_v14 = vadd.f32 %v514_v6, %v3170_v44  ;;  %v2586_v6 = vor.u32 %v2748_v3, %v2585_v0  ;;  %v2462_v7 = vor.u32 %v2714_v4, %v2459_v5  ;;  %1338 = vmatpush.bf16.msra.mxu2 %v2458_v2  ;;  %v2555_v63 = vld [vmem:[#allocation5 + $0x450] sm:$0xf0] }
  0xe3   : > { %v553_v19 = vmax.f32 %v466_v13, 0.0  ;;  %v2558_v0 = vor.u32 %v2738_v62, %v2555_v63  ;;  %v2513_v63 = vld [vmem:[#allocation5 + $0x3e8] sm:$0xf] }
  0xe4   : > { %v554_v21 = vmax.f32 %v515_v14, 0.0  ;;  %1387 = vmatpush.bf16.msra.mxu3 %v2586_v6  ;;  %1436 = vmatpush.bf16.msra.mxu0 %v2462_v7 }
  0xe5   : > { %v482_v11 = vpop.f32.mrf.mxu2  ;;  %1487 = vmatpush.bf16.msra.mxu1 %v2558_v0  ;;  %v2729_v0 = vld [vmem:[#allocation5 + $0x3f4] sm:$0xf0] }
  0xe6   : > { %v531_v13 = vpop.f32.mrf.mxu3  ;;  %1339 = vmatpush.bf16.msra.mxu2 %v2442_v30  ;;  %v483_v40 = vadd.f32 %v482_v11, %v3168_v43 }
  0xe7   : > { %v532_v42 = vadd.f32 %v531_v13, %v3170_v44 }
  0xe8   : > { %v467_v15 = vpop.f32.mrf.mxu0  ;;  %v567_v46 = vmax.f32 %v483_v40, 0.0 }
  0xe9   : > { %v468_v16 = vadd.f32 %v467_v15, %v3168_v43  ;;  %v516_v17 = vpop.f32.mrf.mxu1  ;;  %1488 = vmatpush.bf16.msra.mxu1 %v2542_v39 }
  0xea   : > { %v517_v18 = vadd.f32 %v516_v17, %v3170_v44 }
  0xeb   : > { %v555_v20 = vmax.f32 %v468_v16, 0.0 }
  0xec   : > { %v556_v22 = vmax.f32 %v517_v18, 0.0 }
  0xed   : > { %v583_v25 = vpack.c.bf16 %v555_v20, %v553_v19 }
  0xee   : > { %v584_v29 = vpack.c.bf16 %v556_v22, %v554_v21 }
  0xef   : > { %775 = vmatmul.bf16.gmra.mxu2 %v583_v25  ;;  %873 = vmatmul.bf16.gmra.mxu0 %v583_v25  ;;  %v485_v25 = vpop.f32.mrf.mxu2 }
  0xf0   : > { %824 = vmatmul.bf16.gmra.mxu3 %v584_v29  ;;  %922 = vmatmul.bf16.gmra.mxu1 %v584_v29  ;;  %v470_v31 = vpop.f32.mrf.mxu0  ;;  %v534_v29 = vpop.f32.mrf.mxu3  ;;  %v486_v2 = vadd.f32 %v485_v25, %v3168_v43 }
  0xf1   : > { %v519_v35 = vpop.f32.mrf.mxu1  ;;  %v471_v47 = vadd.f32 %v470_v31, %v3168_v43  ;;  %v2744_v31 = vld [vmem:[#allocation5 + $0x46c] sm:$0xf0]  ;;  %v535_v5 = vadd.f32 %v534_v29, %v3170_v44 }
  0xf2   : > { %v520_v48 = vadd.f32 %v519_v35, %v3170_v44  ;;  %v2570_v34 = vor.u32 %v2744_v31, %v2569_v28  ;;  %v2446_v35 = vor.u32 %v2710_v32, %v2443_v33  ;;  %v569_v7 = vmax.f32 %v486_v2, 0.0  ;;  %v336_v2 = vld [vmem:[#allocation7 + $0x1] ss:$8 sm:$0x3] }
  0xf3   : > { %v557_v53 = vmax.f32 %v471_v47, 0.0  ;;  %v566_v47 = vmax.f32 %v530_v41, 0.0  ;;  %v570_v9 = vmax.f32 %v535_v5, 0.0 }
  0xf4   : > { %v558_v55 = vmax.f32 %v520_v48, 0.0  ;;  %1388 = vmatpush.bf16.msra.mxu3 %v2570_v34  ;;  %1437 = vmatpush.bf16.msra.mxu0 %v2446_v35  ;;  %v568_v48 = vmax.f32 %v532_v42, 0.0 }
  0xf8   : > { %v472_v49 = vpop.f32.mrf.mxu0 }
  0xf9   : > { %v473_v50 = vadd.f32 %v472_v49, %v3168_v43  ;;  %v521_v51 = vpop.f32.mrf.mxu1  ;;  %v487_v49 = vpop.f32.mrf.mxu2 }
  0xfa   : > { %v522_v52 = vadd.f32 %v521_v51, %v3170_v44  ;;  %v589_v51 = vpack.c.bf16 %v567_v46, %v565_v45  ;;  %v488_v3 = vadd.f32 %v487_v49, %v3168_v43 }
  0xfb   : > { %v559_v54 = vmax.f32 %v473_v50, 0.0  ;;  %v536_v50 = vpop.f32.mrf.mxu3 }
  0xfc   : > { %v560_v56 = vmax.f32 %v522_v52, 0.0  ;;  %v590_v52 = vpack.c.bf16 %v568_v48, %v566_v47  ;;  %v537_v6 = vadd.f32 %v536_v50, %v3170_v44  ;;  %v571_v8 = vmax.f32 %v488_v3, 0.0  ;;  %v2393_v47 = vld [vmem:[#allocation5 + $0x300] sm:$0xf]  ;;  %v2700_v48 = vld [vmem:[#allocation5 + $0x30c] sm:$0xf0] }
  0xfd   : > { %v585_v58 = vpack.c.bf16 %v559_v54, %v557_v53  ;;  %v2425_v53 = vld [vmem:[#allocation5 + $0x340] sm:$0xf]  ;;  %v2708_v54 = vld [vmem:[#allocation5 + $0x34c] sm:$0xf0]  ;;  %v2394_v49 = vor.u32 %v2700_v48, %v2393_v47  ;;  %v2641_v3 = vld [vmem:[#allocation5 + $0x4e8] sm:$0xf] }
  0xfe   : > { %v586_v60 = vpack.c.bf16 %v560_v56, %v558_v55  ;;  %v2553_v55 = vld [vmem:[#allocation5 + $0x440] sm:$0xf]  ;;  %v2426_v56 = vor.u32 %v2708_v54, %v2425_v53  ;;  %v572_v10 = vmax.f32 %v537_v6, 0.0  ;;  %v591_v11 = vpack.c.bf16 %v571_v8, %v569_v7  ;;  %v2723_v47 = vld [vmem:[#allocation5 + $0x3cc] sm:$0xf] }
  0xff   : > { %780 = vmatmul.bf16.gmra.mxu2 %v585_v58  ;;  %878 = vmatmul.bf16.gmra.mxu0 %v585_v58  ;;  %v2706_v58 = vld [vmem:[#allocation5 + $0x344] sm:$0xf]  ;;  %v2521_v50 = vld [vmem:[#allocation5 + $0x400] sm:$0xf]  ;;  %v3204_v7 = vperm.slane %v336_v2, 1 }
 0x100   : > { %829 = vmatmul.bf16.gmra.mxu3 %v586_v60  ;;  %927 = vmatmul.bf16.gmra.mxu1 %v586_v60  ;;  %v475_v61 = vpop.f32.mrf.mxu0  ;;  %v2554_v60 = vor.u32 %v2740_v57, %v2553_v55  ;;  %v2499_v48 = vld [vmem:[#allocation5 + $0x3d8] sm:$0xf0] }
 0x101   : > { %v524_v1 = vpop.f32.mrf.mxu1  ;;  %v476_v12 = vadd.f32 %v475_v61, %v3168_v43  ;;  %v2430_v61 = vor.u32 %v2706_v58, %v2427_v59  ;;  %1340 = vmatpush.bf16.msra.mxu2 %v2426_v56  ;;  %v2523_v56 = vld [vmem:[#allocation5 + $0x410] sm:$0xf0] }
 0x102   : > { %v525_v14 = vadd.f32 %v524_v1, %v3170_v44  ;;  %v490_v1 = vpop.f32.mrf.mxu2  ;;  %1389 = vmatpush.bf16.msra.mxu3 %v2554_v60 }
 0x103   : > { %v561_v19 = vmax.f32 %v476_v12, 0.0  ;;  %1438 = vmatpush.bf16.msra.mxu0 %v2430_v61  ;;  %v539_v4 = vpop.f32.mrf.mxu3  ;;  %v592_v12 = vpack.c.bf16 %v572_v10, %v570_v9  ;;  %v2698_v61 = vld [vmem:[#allocation5 + $0x304] sm:$0xf]  ;;  %v2727_v10 = vld [vmem:[#allocation5 + $0x3ec] sm:$0xf] }
 0x104   : > { %v562_v21 = vmax.f32 %v525_v14, 0.0  ;;  %v540_v26 = vadd.f32 %v539_v4, %v3170_v44  ;;  %v2761_v4 = vld [vmem:[#allocation5 + $0x4f4] sm:$0xf0] }
 0x105   : > { %v2642_v6 = vor.u32 %v2761_v4, %v2641_v3 }
 0x106   : > { %v574_v32 = vmax.f32 %v540_v26, 0.0  ;;  %v2725_v26 = vld [vmem:[#allocation5 + $0x3d4] sm:$0xf0] }
 0x108   : > { %v477_v15 = vpop.f32.mrf.mxu0 }
 0x109   : > { %v478_v16 = vadd.f32 %v477_v15, %v3168_v43  ;;  %v526_v17 = vpop.f32.mrf.mxu1  ;;  %v2409_v15 = vld [vmem:[#allocation5 + $0x320] sm:$0xf] }
 0x10a   : > { %v527_v18 = vadd.f32 %v526_v17, %v3170_v44  ;;  %v492_v13 = vpop.f32.mrf.mxu2  ;;  %v2537_v17 = vld [vmem:[#allocation5 + $0x420] sm:$0xf] }
 0x10b   : > { %v563_v20 = vmax.f32 %v478_v16, 0.0  ;;  %v541_v14 = vpop.f32.mrf.mxu3  ;;  %v2704_v16 = vld [vmem:[#allocation5 + $0x32c] sm:$0xf0]  ;;  %v493_v25 = vadd.f32 %v492_v13, %v3168_v43 }
 0x10c   : > { %v564_v22 = vmax.f32 %v527_v18, 0.0  ;;  %v2410_v18 = vor.u32 %v2704_v16, %v2409_v15  ;;  %v542_v27 = vadd.f32 %v541_v14, %v3170_v44  ;;  %v2759_v14 = vld [vmem:[#allocation5 + $0x4ec] sm:$0xf]  ;;  %v2643_v15 = vld [vmem:[#allocation5 + $0x4f8] sm:$0xf0]  ;;  %v3207_v16 = vperm.slane %v336_v2, 0 }
 0x10d   : > { %v587_v23 = vpack.c.bf16 %v563_v20, %v561_v19  ;;  %v2736_v19 = vld [vmem:[#allocation5 + $0x42c] sm:$0xf0]  ;;  %v2702_v20 = vld [vmem:[#allocation5 + $0x324] sm:$0xf]  ;;  %v575_v30 = vmax.f32 %v493_v25, 0.0 }
 0x10e   : > { %v588_v24 = vpack.c.bf16 %v564_v22, %v562_v21  ;;  %v2411_v21 = vld [vmem:[#allocation5 + $0x330] sm:$0xf0]  ;;  %v2538_v22 = vor.u32 %v2736_v19, %v2537_v17  ;;  %1341 = vmatpush.bf16.msra.mxu2 %v2410_v18  ;;  %v576_v33 = vmax.f32 %v542_v27, 0.0  ;;  %v2646_v18 = vor.u32 %v2759_v14, %v2643_v15  ;;  %v2497_v25 = vld [vmem:[#allocation5 + $0x3c8] sm:$0xf] }
 0x10f   : > { %785 = vmatmul.bf16.gmra.mxu2 %v587_v23  ;;  %883 = vmatmul.bf16.gmra.mxu0 %v587_v23  ;;  %v2414_v23 = vor.u32 %v2702_v20, %v2411_v21  ;;  %v2498_v27 = vor.u32 %v2725_v26, %v2497_v25 }
 0x110   : > { %834 = vmatmul.bf16.gmra.mxu3 %v588_v24  ;;  %932 = vmatmul.bf16.gmra.mxu1 %v588_v24  ;;  %v491_v24 = vadd.f32 %v490_v1, %v3168_v43  ;;  %v594_v35 = vpack.c.bf16 %v576_v33, %v574_v32  ;;  %v2514_v1 = vor.u32 %v2729_v0, %v2513_v63 }
 0x111   : > { %1390 = vmatpush.bf16.msra.mxu3 %v2538_v22  ;;  %1439 = vmatpush.bf16.msra.mxu0 %v2414_v23 }
 0x112   : > { %v495_v28 = vpop.f32.mrf.mxu2  ;;  %v573_v29 = vmax.f32 %v491_v24, 0.0  ;;  %1342 = vmatpush.bf16.msra.mxu2 %v2394_v49 }
 0x113   : > { %v544_v31 = vpop.f32.mrf.mxu3  ;;  %v496_v41 = vadd.f32 %v495_v28, %v3168_v43 }
 0x114   : > { %v593_v34 = vpack.c.bf16 %v575_v30, %v573_v29  ;;  %v545_v45 = vadd.f32 %v544_v31, %v3170_v44 }
 0x115   : > { %v577_v53 = vmax.f32 %v496_v41, 0.0 }
 0x116   : > { %v578_v57 = vmax.f32 %v545_v45, 0.0  ;;  %1531 = vmatpush.bf16.msrb.mxu2 %v2514_v1 }
 0x11a   : > { %v497_v38 = vpop.f32.mrf.mxu2  ;;  %1532 = vmatpush.bf16.msrb.mxu2 %v2498_v27 }
 0x11b   : > { %v546_v40 = vpop.f32.mrf.mxu3  ;;  %v498_v42 = vadd.f32 %v497_v38, %v3168_v43 }
 0x11c   : > { %v547_v46 = vadd.f32 %v546_v40, %v3170_v44  ;;  %v2395_v44 = vld [vmem:[#allocation5 + $0x310] sm:$0xf0] }
 0x11d   : > { %v579_v54 = vmax.f32 %v498_v42, 0.0  ;;  %v2398_v62 = vor.u32 %v2698_v61, %v2395_v44  ;;  %v2721_v61 = vld [vmem:[#allocation5 + $0x3b4] sm:$0xf0] }
 0x11e   : > { %v580_v58 = vmax.f32 %v547_v46, 0.0 }
 0x11f   : > { %790 = vmatmul.bf16.gmra.mxu2 %v589_v51  ;;  %888 = vmatmul.bf16.gmra.mxu0 %v589_v51  ;;  %v2732_v51 = vld [vmem:[#allocation5 + $0x40c] sm:$0xf0]  ;;  %v595_v43 = vpack.c.bf16 %v579_v54, %v577_v53 }
 0x120   : > { %839 = vmatmul.bf16.gmra.mxu3 %v590_v52  ;;  %937 = vmatmul.bf16.gmra.mxu1 %v590_v52  ;;  %v2730_v52 = vld [vmem:[#allocation5 + $0x404] sm:$0xf]  ;;  %v2522_v55 = vor.u32 %v2732_v51, %v2521_v50  ;;  %v596_v60 = vpack.c.bf16 %v580_v58, %v578_v57  ;;  %v2502_v50 = vor.u32 %v2723_v47, %v2499_v48  ;;  %v2755_v51 = vld [vmem:[#allocation5 + $0x4cc] sm:$0xf] }
 0x121   : > { %v2526_v59 = vor.u32 %v2730_v52, %v2523_v56  ;;  %1440 = vmatpush.bf16.msra.mxu0 %v2398_v62  ;;  %v2627_v52 = vld [vmem:[#allocation5 + $0x4d8] sm:$0xf0] }
 0x122   : > { %1391 = vmatpush.bf16.msra.mxu3 %v2522_v55  ;;  %v2630_v54 = vor.u32 %v2755_v51, %v2627_v52 }
 0x123   : > { %1489 = vmatpush.bf16.msra.mxu1 %v2526_v59 }
 0x126   : > { %1580 = vmatpush.bf16.msrb.mxu3 %v2642_v6  ;;  %v2753_v6 = vld [vmem:[#allocation5 + $0x4b4] sm:$0xf0] }
 0x127   : > { %1678 = vmatpush.bf16.msrb.mxu1 %v2646_v18  ;;  %v2483_v18 = vld [vmem:[#allocation5 + $0x3b8] sm:$0xf0] }
 0x12b   : > { %1679 = vmatpush.bf16.msrb.mxu1 %v2630_v54 }
 0x12f   : > { %795 = vmatmul.bf16.gmra.mxu2 %v591_v11  ;;  %893 = vmatmul.bf16.gmra.mxu0 %v591_v11  ;;  %v2515_v11 = vld [vmem:[#allocation5 + $0x3f8] sm:$0xf0] }
 0x130   : > { %844 = vmatmul.bf16.gmra.mxu3 %v592_v12  ;;  %942 = vmatmul.bf16.gmra.mxu1 %v592_v12  ;;  %v2518_v13 = vor.u32 %v2727_v10, %v2515_v11 }
 0x132   : > { %1629 = vmatpush.bf16.msrb.mxu0 %v2518_v13 }
 0x136   : > { %1630 = vmatpush.bf16.msrb.mxu0 %v2502_v50 }
 0x13f   : > { %800 = vmatmul.bf16.gmra.mxu2 %v593_v34  ;;  %898 = vmatmul.bf16.gmra.mxu0 %v593_v34 }
 0x140   : > { %849 = vmatmul.bf16.gmra.mxu3 %v594_v35  ;;  %947 = vmatmul.bf16.gmra.mxu1 %v594_v35  ;;  %v2625_v35 = vld [vmem:[#allocation5 + $0x4c8] sm:$0xf] }
 0x141   : > { %v2626_v38 = vor.u32 %v2757_v36, %v2625_v35 }
 0x143   : > { %1581 = vmatpush.bf16.msrb.mxu3 %v2626_v38 }
 0x14f   : > { %805 = vmatmul.bf16.gmra.mxu2 %v595_v43  ;;  %903 = vmatmul.bf16.gmra.mxu0 %v595_v43 }
 0x150   : > { %854 = vmatmul.bf16.gmra.mxu3 %v596_v60  ;;  %952 = vmatmul.bf16.gmra.mxu1 %v596_v60  ;;  %v2481_v60 = vld [vmem:[#allocation5 + $0x3a8] sm:$0xf] }
 0x151   : > { %v2482_v44 = vor.u32 %v2721_v61, %v2481_v60 }
 0x153   : > { %1533 = vmatpush.bf16.msrb.mxu2 %v2482_v44 }
 0x15c   : > { %v869_v5 = vpop.f32.mrf.mxu0 }
 0x15d   : > { %v918_v8 = vpop.f32.mrf.mxu1  ;;  %v870_v9 = vadd.f32 %v869_v5, %v3204_v7  ;;  %v2609_v5 = vld [vmem:[#allocation5 + $0x4a8] sm:$0xf] }
 0x15f   : > { %v919_v20 = vadd.f32 %v918_v8, %v870_v9  ;;  %v2610_v9 = vor.u32 %v2753_v6, %v2609_v5  ;;  %v2713_v5 = vld [vmem:[#allocation5 + $0x374] sm:$0xf0] }
 0x161   : > { %v959_v28 = vmax.f32 %v919_v20, 0.0  ;;  %1582 = vmatpush.bf16.msrb.mxu3 %v2610_v9 }
 0x162   : > { %v771_v12 = vpop.f32.mrf.mxu2 }
 0x163   : > { %v820_v17 = vpop.f32.mrf.mxu3  ;;  %v772_v23 = vadd.f32 %v771_v12, %v3207_v16 }
 0x164   : > { %v871_v19 = vpop.f32.mrf.mxu0 }
 0x165   : > { %v872_v21 = vadd.f32 %v871_v19, %v3204_v7  ;;  %v920_v22 = vpop.f32.mrf.mxu1  ;;  %v821_v31 = vadd.f32 %v820_v17, %v772_v23  ;;  %v2719_v17 = vld [vmem:[#allocation5 + $0x3ac] sm:$0xf] }
 0x166   : > { %v2486_v20 = vor.u32 %v2719_v17, %v2483_v18  ;;  %v2577_v17 = vld [vmem:[#allocation5 + $0x468] sm:$0xf]  ;;  %v2745_v18 = vld [vmem:[#allocation5 + $0x474] sm:$0xf0] }
 0x167   : > { %v921_v24 = vadd.f32 %v920_v22, %v872_v21  ;;  %v958_v41 = vmax.f32 %v821_v31, 0.0  ;;  %v2751_v21 = vld [vmem:[#allocation5 + $0x4ac] sm:$0xf]  ;;  %v2611_v22 = vld [vmem:[#allocation5 + $0x4b8] sm:$0xf0] }
 0x168   : > { %1631 = vmatpush.bf16.msrb.mxu0 %v2486_v20  ;;  %v2465_v31 = vld [vmem:[#allocation5 + $0x388] sm:$0xf]  ;;  %v2578_v20 = vor.u32 %v2745_v18, %v2577_v17 }
 0x169   : > { %v961_v29 = vmax.f32 %v921_v24, 0.0  ;;  %v2614_v24 = vor.u32 %v2751_v21, %v2611_v22 }
 0x16a   : > { %v773_v30 = vpop.f32.mrf.mxu2 }
 0x16b   : > { %v3211_v32 = vpack.c.bf16 %v961_v29, %v959_v28  ;;  %v774_v33 = vadd.f32 %v773_v30, %v3207_v16  ;;  %v822_v34 = vpop.f32.mrf.mxu3  ;;  %1680 = vmatpush.bf16.msrb.mxu1 %v2614_v24 }
 0x16c   : > { %v874_v37 = vpop.f32.mrf.mxu0 }
 0x16d   : > { %v823_v39 = vadd.f32 %v822_v34, %v774_v33  ;;  %v923_v40 = vpop.f32.mrf.mxu1  ;;  %1392 = vmatmul.bf16.vlgmr.msra.gmra.mxu3 %v3211_v32  ;;  %1490 = vmatmul.bf16.vlgmr.msra.gmra.mxu1 %v3211_v32  ;;  %v875_v46 = vadd.f32 %v874_v37, %v3204_v7  ;;  %v2717_v33 = vld [vmem:[#allocation5 + $0x394] sm:$0xf0] }
 0x16e   : > { %v2466_v34 = vor.u32 %v2717_v33, %v2465_v31  ;;  %v2743_v31 = vld [vmem:[#allocation5 + $0x46c] sm:$0xf]  ;;  %v2579_v33 = vld [vmem:[#allocation5 + $0x478] sm:$0xf0] }
 0x16f   : > { %v960_v42 = vmax.f32 %v823_v39, 0.0  ;;  %v924_v56 = vadd.f32 %v923_v40, %v875_v46  ;;  %v2749_v46 = vld [vmem:[#allocation5 + $0x494] sm:$0xf0] }
 0x170   : > { %1534 = vmatpush.bf16.msrb.mxu2 %v2466_v34 }
 0x171   : > { %v3216_v45 = vpack.c.bf16 %v960_v42, %v958_v41  ;;  %v963_v62 = vmax.f32 %v924_v56, 0.0  ;;  %v2593_v42 = vld [vmem:[#allocation5 + $0x488] sm:$0xf]  ;;  %v2467_v56 = vld [vmem:[#allocation5 + $0x398] sm:$0xf0] }
 0x172   : > { %v776_v49 = vpop.f32.mrf.mxu2  ;;  %v2594_v48 = vor.u32 %v2749_v46, %v2593_v42  ;;  %v2433_v46 = vld [vmem:[#allocation5 + $0x348] sm:$0xf] }
 0x173   : > { %v825_v53 = vpop.f32.mrf.mxu3  ;;  %1343 = vmatmul.bf16.vlgmr.msra.gmra.mxu2 %v3216_v45  ;;  %1441 = vmatmul.bf16.vlgmr.msra.gmra.mxu0 %v3216_v45  ;;  %v777_v59 = vadd.f32 %v776_v49, %v3207_v16 }
 0x174   : > { %v876_v55 = vpop.f32.mrf.mxu0  ;;  %1583 = vmatpush.bf16.msrb.mxu3 %v2594_v48 }
 0x175   : > { %v877_v57 = vadd.f32 %v876_v55, %v3204_v7  ;;  %v925_v58 = vpop.f32.mrf.mxu1  ;;  %v826_v1 = vadd.f32 %v825_v53, %v777_v59  ;;  %v2715_v55 = vld [vmem:[#allocation5 + $0x38c] sm:$0xf] }
 0x176   : > { %v2747_v59 = vld [vmem:[#allocation5 + $0x48c] sm:$0xf] }
 0x177   : > { %v926_v43 = vadd.f32 %v925_v58, %v877_v57  ;;  %v962_v12 = vmax.f32 %v826_v1, 0.0  ;;  %v2470_v58 = vor.u32 %v2715_v55, %v2467_v56 }
 0x178   : > { %1584 = vmatpush.bf16.msrb.mxu3 %v2578_v20  ;;  %v2417_v20 = vld [vmem:[#allocation5 + $0x328] sm:$0xf] }
 0x179   : > { %v965_v63 = vmax.f32 %v926_v43, 0.0  ;;  %v2595_v43 = vld [vmem:[#allocation5 + $0x498] sm:$0xf0]  ;;  %1632 = vmatpush.bf16.msrb.mxu0 %v2470_v58  ;;  %v2741_v58 = vld [vmem:[#allocation5 + $0x454] sm:$0xf0] }
 0x17a   : > { %v778_v0 = vpop.f32.mrf.mxu2  ;;  %v2598_v61 = vor.u32 %v2747_v59, %v2595_v43 }
 0x17b   : > { %v3223_v2 = vpack.c.bf16 %v965_v63, %v963_v62  ;;  %v779_v3 = vadd.f32 %v778_v0, %v3207_v16  ;;  %v827_v4 = vpop.f32.mrf.mxu3 }
 0x17c   : > { %v879_v8 = vpop.f32.mrf.mxu0  ;;  %1681 = vmatpush.bf16.msrb.mxu1 %v2598_v61 }
 0x17d   : > { %v828_v10 = vadd.f32 %v827_v4, %v779_v3  ;;  %v928_v11 = vpop.f32.mrf.mxu1  ;;  %1397 = vmatmul.bf16.gmra.mxu3 %v3223_v2  ;;  %1495 = vmatmul.bf16.gmra.mxu1 %v3223_v2  ;;  %v880_v15 = vadd.f32 %v879_v8, %v3204_v7  ;;  %v2449_v4 = vld [vmem:[#allocation5 + $0x368] sm:$0xf] }
 0x17e   : > { %v2450_v6 = vor.u32 %v2713_v5, %v2449_v4 }
 0x17f   : > { %v964_v13 = vmax.f32 %v828_v10, 0.0  ;;  %v929_v26 = vadd.f32 %v928_v11, %v880_v15 }
 0x180   : > { %1535 = vmatpush.bf16.msrb.mxu2 %v2450_v6  ;;  %v2739_v6 = vld [vmem:[#allocation5 + $0x44c] sm:$0xf] }
 0x181   : > { %v3228_v14 = vpack.c.bf16 %v964_v13, %v962_v12  ;;  %v967_v35 = vmax.f32 %v929_v26, 0.0 }
 0x182   : > { %v781_v19 = vpop.f32.mrf.mxu2 }
 0x183   : > { %v830_v23 = vpop.f32.mrf.mxu3  ;;  %1348 = vmatmul.bf16.gmra.mxu2 %v3228_v14  ;;  %1446 = vmatmul.bf16.gmra.mxu0 %v3228_v14  ;;  %v782_v29 = vadd.f32 %v781_v19, %v3207_v16 }
 0x184   : > { %v881_v25 = vpop.f32.mrf.mxu0 }
 0x185   : > { %v882_v27 = vadd.f32 %v881_v25, %v3204_v7  ;;  %v930_v28 = vpop.f32.mrf.mxu1  ;;  %v831_v38 = vadd.f32 %v830_v23, %v782_v29 }
 0x187   : > { %v931_v30 = vadd.f32 %v930_v28, %v882_v27  ;;  %v966_v51 = vmax.f32 %v831_v38, 0.0  ;;  %v2711_v27 = vld [vmem:[#allocation5 + $0x36c] sm:$0xf]  ;;  %v2451_v28 = vld [vmem:[#allocation5 + $0x378] sm:$0xf0] }
 0x189   : > { %v969_v36 = vmax.f32 %v931_v30, 0.0  ;;  %v2454_v30 = vor.u32 %v2711_v27, %v2451_v28 }
 0x18a   : > { %v783_v37 = vpop.f32.mrf.mxu2 }
 0x18b   : > { %v3235_v39 = vpack.c.bf16 %v969_v36, %v967_v35  ;;  %v784_v40 = vadd.f32 %v783_v37, %v3207_v16  ;;  %v832_v41 = vpop.f32.mrf.mxu3  ;;  %v2582_v35 = vor.u32 %v2743_v31, %v2579_v33  ;;  %1633 = vmatpush.bf16.msrb.mxu0 %v2454_v30  ;;  %v2545_v31 = vld [vmem:[#allocation5 + $0x428] sm:$0xf]  ;;  %v2737_v33 = vld [vmem:[#allocation5 + $0x434] sm:$0xf0] }
 0x18c   : > { %v884_v47 = vpop.f32.mrf.mxu0 }
 0x18d   : > { %v833_v49 = vadd.f32 %v832_v41, %v784_v40  ;;  %v933_v50 = vpop.f32.mrf.mxu1  ;;  %1402 = vmatmul.bf16.gmra.mxu3 %v3235_v39  ;;  %1500 = vmatmul.bf16.gmra.mxu1 %v3235_v39  ;;  %v885_v54 = vadd.f32 %v884_v47, %v3204_v7  ;;  %v2709_v47 = vld [vmem:[#allocation5 + $0x354] sm:$0xf0] }
 0x18e   : > { %1682 = vmatpush.bf16.msrb.mxu1 %v2582_v35  ;;  %v2434_v48 = vor.u32 %v2709_v47, %v2433_v46  ;;  %v2546_v35 = vor.u32 %v2737_v33, %v2545_v31  ;;  %v2703_v46 = vld [vmem:[#allocation5 + $0x32c] sm:$0xf]  ;;  %v2419_v47 = vld [vmem:[#allocation5 + $0x338] sm:$0xf0] }
 0x18f   : > { %v968_v52 = vmax.f32 %v833_v49, 0.0  ;;  %v934_v62 = vadd.f32 %v933_v50, %v885_v54 }
 0x190   : > { %1536 = vmatpush.bf16.msrb.mxu2 %v2434_v48 }
 0x191   : > { %v3240_v53 = vpack.c.bf16 %v968_v52, %v966_v51  ;;  %v971_v8 = vmax.f32 %v934_v62, 0.0 }
 0x192   : > { %v786_v57 = vpop.f32.mrf.mxu2 }
 0x193   : > { %v835_v60 = vpop.f32.mrf.mxu3  ;;  %1353 = vmatmul.bf16.gmra.mxu2 %v3240_v53  ;;  %1451 = vmatmul.bf16.gmra.mxu0 %v3240_v53  ;;  %v787_v1 = vadd.f32 %v786_v57, %v3207_v16  ;;  %v2561_v57 = vld [vmem:[#allocation5 + $0x448] sm:$0xf] }
 0x194   : > { %v886_v44 = vpop.f32.mrf.mxu0  ;;  %v2562_v43 = vor.u32 %v2741_v58, %v2561_v57  ;;  %v2701_v57 = vld [vmem:[#allocation5 + $0x314] sm:$0xf0]  ;;  %v2529_v58 = vld [vmem:[#allocation5 + $0x408] sm:$0xf] }
 0x195   : > { %v887_v63 = vadd.f32 %v886_v44, %v3204_v7  ;;  %v935_v0 = vpop.f32.mrf.mxu1  ;;  %v836_v11 = vadd.f32 %v835_v60, %v787_v1  ;;  %v2707_v1 = vld [vmem:[#allocation5 + $0x34c] sm:$0xf] }
 0x196   : > { %1585 = vmatpush.bf16.msrb.mxu3 %v2562_v43 }
 0x197   : > { %v936_v3 = vadd.f32 %v935_v0, %v887_v63  ;;  %v970_v23 = vmax.f32 %v836_v11, 0.0 }
 0x199   : > { %v973_v9 = vmax.f32 %v936_v3, 0.0  ;;  %v2435_v3 = vld [vmem:[#allocation5 + $0x358] sm:$0xf0] }
 0x19a   : > { %v788_v10 = vpop.f32.mrf.mxu2  ;;  %v2438_v5 = vor.u32 %v2707_v1, %v2435_v3  ;;  %1586 = vmatpush.bf16.msrb.mxu3 %v2546_v35 }
 0x19b   : > { %v3247_v12 = vpack.c.bf16 %v973_v9, %v971_v8  ;;  %v789_v13 = vadd.f32 %v788_v10, %v3207_v16  ;;  %v837_v15 = vpop.f32.mrf.mxu3  ;;  %v2563_v8 = vld [vmem:[#allocation5 + $0x458] sm:$0xf0] }
 0x19c   : > { %v889_v19 = vpop.f32.mrf.mxu0  ;;  %v2566_v10 = vor.u32 %v2739_v6, %v2563_v8  ;;  %1634 = vmatpush.bf16.msrb.mxu0 %v2438_v5  ;;  %v2531_v5 = vld [vmem:[#allocation5 + $0x418] sm:$0xf0] }
 0x19d   : > { %v838_v21 = vadd.f32 %v837_v15, %v789_v13  ;;  %v938_v22 = vpop.f32.mrf.mxu1  ;;  %1407 = vmatmul.bf16.gmra.mxu3 %v3247_v12  ;;  %1505 = vmatmul.bf16.gmra.mxu1 %v3247_v12  ;;  %v890_v26 = vadd.f32 %v889_v19, %v3204_v7 }
 0x19e   : > { %1683 = vmatpush.bf16.msrb.mxu1 %v2566_v10 }
 0x19f   : > { %v972_v24 = vmax.f32 %v838_v21, 0.0  ;;  %v939_v37 = vadd.f32 %v938_v22, %v890_v26  ;;  %v2705_v21 = vld [vmem:[#allocation5 + $0x334] sm:$0xf0] }
 0x1a0   : > { %v2418_v22 = vor.u32 %v2705_v21, %v2417_v20 }
 0x1a1   : > { %v3252_v25 = vpack.c.bf16 %v972_v24, %v970_v23  ;;  %v975_v49 = vmax.f32 %v939_v37, 0.0 }
 0x1a2   : > { %v791_v29 = vpop.f32.mrf.mxu2  ;;  %1537 = vmatpush.bf16.msrb.mxu2 %v2418_v22 }
 0x1a3   : > { %v840_v34 = vpop.f32.mrf.mxu3  ;;  %1358 = vmatmul.bf16.gmra.mxu2 %v3252_v25  ;;  %1456 = vmatmul.bf16.gmra.mxu0 %v3252_v25  ;;  %v792_v41 = vadd.f32 %v791_v29, %v3207_v16 }
 0x1a4   : > { %v891_v36 = vpop.f32.mrf.mxu0 }
 0x1a5   : > { %v892_v38 = vadd.f32 %v891_v36, %v3204_v7  ;;  %v940_v40 = vpop.f32.mrf.mxu1  ;;  %v841_v52 = vadd.f32 %v840_v34, %v792_v41 }
 0x1a7   : > { %v941_v42 = vadd.f32 %v940_v40, %v892_v38  ;;  %v974_v44 = vmax.f32 %v841_v52, 0.0 }
 0x1a9   : > { %v977_v50 = vmax.f32 %v941_v42, 0.0 }
 0x1aa   : > { %v793_v51 = vpop.f32.mrf.mxu2 }
 0x1ab   : > { %v3259_v54 = vpack.c.bf16 %v977_v50, %v975_v49  ;;  %v794_v55 = vadd.f32 %v793_v51, %v3207_v16  ;;  %v842_v56 = vpop.f32.mrf.mxu3  ;;  %v2422_v49 = vor.u32 %v2703_v46, %v2419_v47  ;;  %v2735_v50 = vld [vmem:[#allocation5 + $0x42c] sm:$0xf]  ;;  %v2547_v51 = vld [vmem:[#allocation5 + $0x438] sm:$0xf0] }
 0x1ac   : > { %v894_v59 = vpop.f32.mrf.mxu0 }
 0x1ad   : > { %v843_v60 = vadd.f32 %v842_v56, %v794_v55  ;;  %v943_v61 = vpop.f32.mrf.mxu1  ;;  %1412 = vmatmul.bf16.gmra.mxu3 %v3259_v54  ;;  %1510 = vmatmul.bf16.gmra.mxu1 %v3259_v54  ;;  %v895_v0 = vadd.f32 %v894_v59, %v3204_v7  ;;  %v2550_v55 = vor.u32 %v2735_v50, %v2547_v51  ;;  %v2401_v56 = vld [vmem:[#allocation5 + $0x308] sm:$0xf] }
 0x1ae   : > { %1635 = vmatpush.bf16.msrb.mxu0 %v2422_v49  ;;  %v2402_v43 = vor.u32 %v2701_v57, %v2401_v56  ;;  %v3304_v57 = vld [vmem:[#allocation7 + $0x2] ss:$8 sm:$0xf] }
 0x1af   : > { %v976_v62 = vmax.f32 %v843_v60, 0.0  ;;  %v944_v13 = vadd.f32 %v943_v61, %v895_v0  ;;  %v2733_v60 = vld [vmem:[#allocation5 + $0x414] sm:$0xf0]  ;;  %1684 = vmatpush.bf16.msrb.mxu1 %v2550_v55 }
 0x1b0   : > { %v2530_v0 = vor.u32 %v2733_v60, %v2529_v58  ;;  %1538 = vmatpush.bf16.msrb.mxu2 %v2402_v43 }
 0x1b1   : > { %v3264_v63 = vpack.c.bf16 %v976_v62, %v974_v44  ;;  %v979_v23 = vmax.f32 %v944_v13, 0.0  ;;  %v2403_v13 = vld [vmem:[#allocation5 + $0x318] sm:$0xf0] }
 0x1b2   : > { %v796_v4 = vpop.f32.mrf.mxu2  ;;  %1587 = vmatpush.bf16.msrb.mxu3 %v2530_v0 }
 0x1b3   : > { %v845_v9 = vpop.f32.mrf.mxu3  ;;  %1363 = vmatmul.bf16.gmra.mxu2 %v3264_v63  ;;  %1461 = vmatmul.bf16.gmra.mxu0 %v3264_v63  ;;  %v797_v18 = vadd.f32 %v796_v4, %v3207_v16  ;;  %v2731_v4 = vld [vmem:[#allocation5 + $0x40c] sm:$0xf] }
 0x1b4   : > { %v896_v11 = vpop.f32.mrf.mxu0 }
 0x1b5   : > { %v897_v15 = vadd.f32 %v896_v11, %v3204_v7  ;;  %v945_v17 = vpop.f32.mrf.mxu1  ;;  %v846_v27 = vadd.f32 %v845_v9, %v797_v18  ;;  %v2534_v9 = vor.u32 %v2731_v4, %v2531_v5  ;;  %v2699_v11 = vld [vmem:[#allocation5 + $0x30c] sm:$0xf] }
 0x1b6   : > { %v2406_v20 = vor.u32 %v2699_v11, %v2403_v13 }
 0x1b7   : > { %v946_v19 = vadd.f32 %v945_v17, %v897_v15  ;;  %v978_v38 = vmax.f32 %v846_v27, 0.0  ;;  %1685 = vmatpush.bf16.msrb.mxu1 %v2534_v9 }
 0x1b8   : > { %1636 = vmatpush.bf16.msrb.mxu0 %v2406_v20 }
 0x1b9   : > { %v981_v24 = vmax.f32 %v946_v19, 0.0 }
 0x1ba   : > { %v798_v26 = vpop.f32.mrf.mxu2 }
 0x1bb   : > { %v3271_v28 = vpack.c.bf16 %v981_v24, %v979_v23  ;;  %v799_v29 = vadd.f32 %v798_v26, %v3207_v16  ;;  %v847_v30 = vpop.f32.mrf.mxu3 }
 0x1bc   : > { %v899_v34 = vpop.f32.mrf.mxu0 }
 0x1bd   : > { %v848_v36 = vadd.f32 %v847_v30, %v799_v29  ;;  %v948_v37 = vpop.f32.mrf.mxu1  ;;  %1417 = vmatmul.bf16.gmra.mxu3 %v3271_v28  ;;  %1515 = vmatmul.bf16.gmra.mxu1 %v3271_v28  ;;  %v900_v42 = vadd.f32 %v899_v34, %v3204_v7 }
 0x1bf   : > { %v980_v40 = vmax.f32 %v848_v36, 0.0  ;;  %v949_v61 = vadd.f32 %v948_v37, %v900_v42 }
 0x1c1   : > { %v3276_v41 = vpack.c.bf16 %v980_v40, %v978_v38  ;;  %v983_v6 = vmax.f32 %v949_v61, 0.0 }
 0x1c2   : > { %v801_v48 = vpop.f32.mrf.mxu2 }
 0x1c3   : > { %v850_v52 = vpop.f32.mrf.mxu3  ;;  %1368 = vmatmul.bf16.gmra.mxu2 %v3276_v41  ;;  %1466 = vmatmul.bf16.gmra.mxu0 %v3276_v41  ;;  %v802_v1 = vadd.f32 %v801_v48, %v3207_v16 }
 0x1c4   : > { %v901_v59 = vpop.f32.mrf.mxu0 }
 0x1c5   : > { %v902_v44 = vadd.f32 %v901_v59, %v3204_v7  ;;  %v950_v62 = vpop.f32.mrf.mxu1  ;;  %v851_v15 = vadd.f32 %v850_v52, %v802_v1 }
 0x1c7   : > { %v951_v3 = vadd.f32 %v950_v62, %v902_v44  ;;  %v982_v24 = vmax.f32 %v851_v15, 0.0  ;;  %v3315_v44 = vperm.slane %v3304_v57, 0  ;;  %v3317_v62 = vld [vmem:[#allocation7 + $0x3] ss:$8 sm:$0xf] }
 0x1c8   : > { %v3321_v1 = vperm.slane %v3317_v62, 1 }
 0x1c9   : > { %v985_v8 = vmax.f32 %v951_v3, 0.0 }
 0x1ca   : > { %v803_v10 = vpop.f32.mrf.mxu2 }
 0x1cb   : > { %v3283_v17 = vpack.c.bf16 %v985_v8, %v983_v6  ;;  %v804_v18 = vadd.f32 %v803_v10, %v3207_v16  ;;  %v852_v19 = vpop.f32.mrf.mxu3  ;;  %v3324_v8 = vperm.slane %v3317_v62, 0 }
 0x1cc   : > { %v904_v21 = vpop.f32.mrf.mxu0 }
 0x1cd   : > { %v853_v22 = vadd.f32 %v852_v19, %v804_v18  ;;  %v953_v23 = vpop.f32.mrf.mxu1  ;;  %1422 = vmatmul.bf16.gmra.mxu3 %v3283_v17  ;;  %1520 = vmatmul.bf16.gmra.mxu1 %v3283_v17  ;;  %v905_v29 = vadd.f32 %v904_v21, %v3204_v7 }
 0x1cf   : > { %v984_v26 = vmax.f32 %v853_v22, 0.0  ;;  %v954_v34 = vadd.f32 %v953_v23, %v905_v29 }
 0x1d1   : > { %v3288_v27 = vpack.c.bf16 %v984_v26, %v982_v24  ;;  %v987_v40 = vmax.f32 %v954_v34, 0.0 }
 0x1d2   : > { %v806_v30 = vpop.f32.mrf.mxu2 }
 0x1d3   : > { %v855_v31 = vpop.f32.mrf.mxu3  ;;  %1373 = vmatmul.bf16.gmra.mxu2 %v3288_v27  ;;  %1471 = vmatmul.bf16.gmra.mxu0 %v3288_v27  ;;  %v807_v37 = vadd.f32 %v806_v30, %v3207_v16 }
 0x1d4   : > { %v906_v33 = vpop.f32.mrf.mxu0 }
 0x1d5   : > { %v907_v35 = vadd.f32 %v906_v33, %v3204_v7  ;;  %v955_v36 = vpop.f32.mrf.mxu1  ;;  %v856_v47 = vadd.f32 %v855_v31, %v807_v37 }
 0x1d7   : > { %v956_v38 = vadd.f32 %v955_v36, %v907_v35  ;;  %v986_v52 = vmax.f32 %v856_v47, 0.0 }
 0x1d9   : > { %v989_v42 = vmax.f32 %v956_v38, 0.0 }
 0x1da   : > { %v808_v46 = vpop.f32.mrf.mxu2 }
 0x1db   : > { %v3295_v48 = vpack.c.bf16 %v989_v42, %v987_v40  ;;  %v809_v49 = vadd.f32 %v808_v46, %v3207_v16  ;;  %v857_v50 = vpop.f32.mrf.mxu3  ;;  %v3309_v16 = vperm.slane %v3304_v57, 1 }
 0x1dd   : > { %v858_v51 = vadd.f32 %v857_v50, %v809_v49  ;;  %1427 = vmatmul.bf16.gmra.mxu3 %v3295_v48  ;;  %1525 = vmatmul.bf16.gmra.mxu1 %v3295_v48 }
 0x1df   : > { %v988_v7 = vmax.f32 %v858_v51, 0.0 }
 0x1e1   : > { %v3300_v55 = vpack.c.bf16 %v988_v7, %v986_v52 }
 0x1e3   : > { %1378 = vmatmul.bf16.gmra.mxu2 %v3300_v55  ;;  %1476 = vmatmul.bf16.gmra.mxu0 %v3300_v55 }
 0x1ea   : > { %v1491_v56 = vpop.f32.mrf.mxu1 }
 0x1ed   : > { %1588 = vmatmul.bf16.vlgmr.msrb.gmra.mxu3 %v3211_v32  ;;  %1686 = vmatmul.bf16.vlgmr.msrb.gmra.mxu1 %v3211_v32 }
 0x1f0   : > { %v1393_v58 = vpop.f32.mrf.mxu3  ;;  %v1442_v59 = vpop.f32.mrf.mxu0 }
 0x1f1   : > { %v1443_v43 = vadd.f32 %v1442_v59, %v3309_v16 }
 0x1f2   : > { %v1493_v60 = vpop.f32.mrf.mxu1 }
 0x1f3   : > { %v1492_v61 = vadd.f32 %v1491_v56, %v1443_v43  ;;  %1539 = vmatmul.bf16.vlgmr.msrb.gmra.mxu2 %v3216_v45  ;;  %1637 = vmatmul.bf16.vlgmr.msrb.gmra.mxu0 %v3216_v45 }
 0x1f5   : > { %v1728_v5 = vmax.f32 %v1492_v61, 0.0 }
 0x1f6   : > { %v1344_v0 = vpop.f32.mrf.mxu2 }
 0x1f7   : > { %v1345_v32 = vadd.f32 %v1344_v0, %v3315_v44  ;;  %v1801_v13 = vmul.f32 %v3321_v1, %v1728_v5 }
 0x1f8   : > { %v1395_v3 = vpop.f32.mrf.mxu3  ;;  %v1444_v4 = vpop.f32.mrf.mxu0 }
 0x1f9   : > { %v1394_v6 = vadd.f32 %v1393_v58, %v1345_v32  ;;  %v1445_v45 = vadd.f32 %v1444_v4, %v3309_v16 }
 0x1fa   : > { %v1496_v9 = vpop.f32.mrf.mxu1 }
 0x1fb   : > { %v1727_v10 = vmax.f32 %v1394_v6, 0.0  ;;  %v1494_v11 = vadd.f32 %v1493_v60, %v1445_v45 }
 0x1fd   : > { %v1800_v15 = vmul.f32 %v3324_v8, %v1727_v10  ;;  %1593 = vmatmul.bf16.gmra.mxu3 %v3223_v2  ;;  %1691 = vmatmul.bf16.gmra.mxu1 %v3223_v2  ;;  %v1732_v23 = vmax.f32 %v1494_v11, 0.0 }
 0x1fe   : > { %v1346_v18 = vpop.f32.mrf.mxu2 }
 0x1ff   : > { %v1347_v19 = vadd.f32 %v1346_v18, %v3315_v44  ;;  %v3332_v20 = vadd.f32 %v1801_v13, %v1800_v15  ;;  %v1805_v2 = vmul.f32 %v3321_v1, %v1732_v23 }
 0x200   : > { %v1398_v21 = vpop.f32.mrf.mxu3  ;;  %v1447_v22 = vpop.f32.mrf.mxu0 }
 0x201   : > { %v1396_v24 = vadd.f32 %v1395_v3, %v1347_v19  ;;  %v1448_v26 = vadd.f32 %v1447_v22, %v3309_v16 }
 0x202   : > { %v1498_v29 = vpop.f32.mrf.mxu1 }
 0x203   : > { %v1731_v30 = vmax.f32 %v1396_v24, 0.0  ;;  %v1497_v31 = vadd.f32 %v1496_v9, %v1448_v26  ;;  %1544 = vmatmul.bf16.gmra.mxu2 %v3228_v14  ;;  %1642 = vmatmul.bf16.gmra.mxu0 %v3228_v14 }
 0x205   : > { %v1804_v33 = vmul.f32 %v3324_v8, %v1731_v30  ;;  %v1736_v40 = vmax.f32 %v1497_v31, 0.0 }
 0x206   : > { %v1349_v34 = vpop.f32.mrf.mxu2 }
 0x207   : > { %v1350_v35 = vadd.f32 %v1349_v34, %v3315_v44  ;;  %v3340_v36 = vadd.f32 %v1805_v2, %v1804_v33  ;;  %v1809_v14 = vmul.f32 %v3321_v1, %v1736_v40 }
 0x208   : > { %v1400_v37 = vpop.f32.mrf.mxu3  ;;  %v1449_v38 = vpop.f32.mrf.mxu0 }
 0x209   : > { %v1399_v42 = vadd.f32 %v1398_v21, %v1350_v35  ;;  %v1450_v46 = vadd.f32 %v1449_v38, %v3309_v16 }
 0x20a   : > { %v1501_v47 = vpop.f32.mrf.mxu1 }
 0x20b   : > { %v1735_v49 = vmax.f32 %v1399_v42, 0.0  ;;  %v1499_v50 = vadd.f32 %v1498_v29, %v1450_v46 }
 0x20d   : > { %v1808_v51 = vmul.f32 %v3324_v8, %v1735_v49  ;;  %1598 = vmatmul.bf16.gmra.mxu3 %v3235_v39  ;;  %1696 = vmatmul.bf16.gmra.mxu1 %v3235_v39  ;;  %v1740_v43 = vmax.f32 %v1499_v50, 0.0 }
 0x20e   : > { %v1351_v52 = vpop.f32.mrf.mxu2 }
 0x20f   : > { %v1352_v7 = vadd.f32 %v1351_v52, %v3315_v44  ;;  %v3348_v56 = vadd.f32 %v1809_v14, %v1808_v51  ;;  %v1813_v39 = vmul.f32 %v3321_v1, %v1740_v43 }
 0x210   : > { %v1403_v58 = vpop.f32.mrf.mxu3  ;;  %v1452_v59 = vpop.f32.mrf.mxu0 }
 0x211   : > { %v1401_v60 = vadd.f32 %v1400_v37, %v1352_v7  ;;  %v1453_v61 = vadd.f32 %v1452_v59, %v3309_v16 }
 0x212   : > { %v1503_v0 = vpop.f32.mrf.mxu1 }
 0x213   : > { %v1739_v32 = vmax.f32 %v1401_v60, 0.0  ;;  %v1502_v3 = vadd.f32 %v1501_v47, %v1453_v61  ;;  %1549 = vmatmul.bf16.gmra.mxu2 %v3240_v53  ;;  %1647 = vmatmul.bf16.gmra.mxu0 %v3240_v53 }
 0x215   : > { %v1812_v4 = vmul.f32 %v3324_v8, %v1739_v32  ;;  %v1744_v11 = vmax.f32 %v1502_v3, 0.0 }
 0x216   : > { %v1354_v5 = vpop.f32.mrf.mxu2 }
 0x217   : > { %v1355_v6 = vadd.f32 %v1354_v5, %v3315_v44  ;;  %v3356_v45 = vadd.f32 %v1813_v39, %v1812_v4  ;;  %v1817_v53 = vmul.f32 %v3321_v1, %v1744_v11 }
 0x218   : > { %v1405_v9 = vpop.f32.mrf.mxu3  ;;  %v1454_v10 = vpop.f32.mrf.mxu0 }
 0x219   : > { %v1404_v13 = vadd.f32 %v1403_v58, %v1355_v6  ;;  %v1455_v15 = vadd.f32 %v1454_v10, %v3309_v16 }
 0x21a   : > { %v1506_v18 = vpop.f32.mrf.mxu1 }
 0x21b   : > { %v1743_v19 = vmax.f32 %v1404_v13, 0.0  ;;  %v1504_v21 = vadd.f32 %v1503_v0, %v1455_v15 }
 0x21d   : > { %v1816_v22 = vmul.f32 %v3324_v8, %v1743_v19  ;;  %1603 = vmatmul.bf16.gmra.mxu3 %v3247_v12  ;;  %1701 = vmatmul.bf16.gmra.mxu1 %v3247_v12  ;;  %v1748_v31 = vmax.f32 %v1504_v21, 0.0 }
 0x21e   : > { %v1356_v23 = vpop.f32.mrf.mxu2 }
 0x21f   : > { %v1357_v24 = vadd.f32 %v1356_v23, %v3315_v44  ;;  %v3364_v26 = vadd.f32 %v1817_v53, %v1816_v22  ;;  %v1821_v12 = vmul.f32 %v3321_v1, %v1748_v31 }
 0x220   : > { %v1408_v29 = vpop.f32.mrf.mxu3  ;;  %v1457_v30 = vpop.f32.mrf.mxu0 }
 0x221   : > { %v1406_v2 = vadd.f32 %v1405_v9, %v1357_v24  ;;  %v1458_v33 = vadd.f32 %v1457_v30, %v3309_v16 }
 0x222   : > { %v1508_v34 = vpop.f32.mrf.mxu1 }
 0x223   : > { %v1747_v35 = vmax.f32 %v1406_v2, 0.0  ;;  %v1507_v37 = vadd.f32 %v1506_v18, %v1458_v33  ;;  %1554 = vmatmul.bf16.gmra.mxu2 %v3252_v25  ;;  %1652 = vmatmul.bf16.gmra.mxu0 %v3252_v25 }
 0x225   : > { %v1820_v38 = vmul.f32 %v3324_v8, %v1747_v35  ;;  %v1752_v50 = vmax.f32 %v1507_v37, 0.0 }
 0x226   : > { %v1359_v40 = vpop.f32.mrf.mxu2 }
 0x227   : > { %v1360_v42 = vadd.f32 %v1359_v40, %v3315_v44  ;;  %v3372_v46 = vadd.f32 %v1821_v12, %v1820_v38  ;;  %v1825_v25 = vmul.f32 %v3321_v1, %v1752_v50 }
 0x228   : > { %v1410_v47 = vpop.f32.mrf.mxu3  ;;  %v1459_v49 = vpop.f32.mrf.mxu0 }
 0x229   : > { %v1409_v14 = vadd.f32 %v1408_v29, %v1360_v42  ;;  %v1460_v51 = vadd.f32 %v1459_v49, %v3309_v16 }
 0x22a   : > { %v1511_v52 = vpop.f32.mrf.mxu1 }
 0x22b   : > { %v1751_v7 = vmax.f32 %v1409_v14, 0.0  ;;  %v1509_v58 = vadd.f32 %v1508_v34, %v1460_v51 }
 0x22d   : > { %v1824_v59 = vmul.f32 %v3324_v8, %v1751_v7  ;;  %1608 = vmatmul.bf16.gmra.mxu3 %v3259_v54  ;;  %1706 = vmatmul.bf16.gmra.mxu1 %v3259_v54  ;;  %v1756_v3 = vmax.f32 %v1509_v58, 0.0 }
 0x22e   : > { %v1361_v43 = vpop.f32.mrf.mxu2 }
 0x22f   : > { %v1362_v60 = vadd.f32 %v1361_v43, %v3315_v44  ;;  %v3380_v61 = vadd.f32 %v1825_v25, %v1824_v59  ;;  %v1829_v54 = vmul.f32 %v3321_v1, %v1756_v3 }
 0x230   : > { %v1413_v0 = vpop.f32.mrf.mxu3  ;;  %v1462_v32 = vpop.f32.mrf.mxu0 }
 0x231   : > { %v1411_v39 = vadd.f32 %v1410_v47, %v1362_v60  ;;  %v1463_v4 = vadd.f32 %v1462_v32, %v3309_v16 }
 0x232   : > { %v1513_v5 = vpop.f32.mrf.mxu1 }
 0x233   : > { %v1755_v6 = vmax.f32 %v1411_v39, 0.0  ;;  %v1512_v9 = vadd.f32 %v1511_v52, %v1463_v4  ;;  %1559 = vmatmul.bf16.gmra.mxu2 %v3264_v63  ;;  %1657 = vmatmul.bf16.gmra.mxu0 %v3264_v63 }
 0x235   : > { %v1828_v10 = vmul.f32 %v3324_v8, %v1755_v6  ;;  %v1760_v21 = vmax.f32 %v1512_v9, 0.0 }
 0x236   : > { %v1364_v11 = vpop.f32.mrf.mxu2 }
 0x237   : > { %v1365_v13 = vadd.f32 %v1364_v11, %v3315_v44  ;;  %v3388_v15 = vadd.f32 %v1829_v54, %v1828_v10  ;;  %v1833_v63 = vmul.f32 %v3321_v1, %v1760_v21 }
 0x238   : > { %v1415_v18 = vpop.f32.mrf.mxu3  ;;  %v1464_v19 = vpop.f32.mrf.mxu0 }
 0x239   : > { %v1414_v53 = vadd.f32 %v1413_v0, %v1365_v13  ;;  %v1465_v22 = vadd.f32 %v1464_v19, %v3309_v16 }
 0x23a   : > { %v1516_v23 = vpop.f32.mrf.mxu1 }
 0x23b   : > { %v1759_v24 = vmax.f32 %v1414_v53, 0.0  ;;  %v1514_v29 = vadd.f32 %v1513_v5, %v1465_v22 }
 0x23d   : > { %v1832_v30 = vmul.f32 %v3324_v8, %v1759_v24  ;;  %1613 = vmatmul.bf16.gmra.mxu3 %v3271_v28  ;;  %1711 = vmatmul.bf16.gmra.mxu1 %v3271_v28  ;;  %v1764_v37 = vmax.f32 %v1514_v29, 0.0 }
 0x23e   : > { %v1366_v31 = vpop.f32.mrf.mxu2 }
 0x23f   : > { %v1367_v2 = vadd.f32 %v1366_v31, %v3315_v44  ;;  %v3396_v33 = vadd.f32 %v1833_v63, %v1832_v30  ;;  %v1837_v28 = vmul.f32 %v3321_v1, %v1764_v37 }
 0x240   : > { %v1418_v34 = vpop.f32.mrf.mxu3  ;;  %v1467_v35 = vpop.f32.mrf.mxu0 }
 0x241   : > { %v1416_v12 = vadd.f32 %v1415_v18, %v1367_v2  ;;  %v1468_v38 = vadd.f32 %v1467_v35, %v3309_v16 }
 0x242   : > { %v1518_v40 = vpop.f32.mrf.mxu1 }
 0x243   : > { %v1763_v42 = vmax.f32 %v1416_v12, 0.0  ;;  %v1517_v47 = vadd.f32 %v1516_v23, %v1468_v38  ;;  %1564 = vmatmul.bf16.gmra.mxu2 %v3276_v41  ;;  %1662 = vmatmul.bf16.gmra.mxu0 %v3276_v41 }
 0x245   : > { %v1836_v49 = vmul.f32 %v3324_v8, %v1763_v42  ;;  %v1768_v58 = vmax.f32 %v1517_v47, 0.0 }
 0x246   : > { %v1369_v50 = vpop.f32.mrf.mxu2 }
 0x247   : > { %v1370_v14 = vadd.f32 %v1369_v50, %v3315_v44  ;;  %v3404_v51 = vadd.f32 %v1837_v28, %v1836_v49  ;;  %v1841_v41 = vmul.f32 %v3321_v1, %v1768_v58 }
 0x248   : > { %v1420_v52 = vpop.f32.mrf.mxu3  ;;  %v1469_v7 = vpop.f32.mrf.mxu0 }
 0x249   : > { %v1419_v25 = vadd.f32 %v1418_v34, %v1370_v14  ;;  %v1470_v59 = vadd.f32 %v1469_v7, %v3309_v16 }
 0x24a   : > { %v1521_v43 = vpop.f32.mrf.mxu1 }
 0x24b   : > { %v1767_v60 = vmax.f32 %v1419_v25, 0.0  ;;  %v1519_v0 = vadd.f32 %v1518_v40, %v1470_v59 }
 0x24d   : > { %v1840_v32 = vmul.f32 %v3324_v8, %v1767_v60  ;;  %1618 = vmatmul.bf16.gmra.mxu3 %v3283_v17  ;;  %1716 = vmatmul.bf16.gmra.mxu1 %v3283_v17  ;;  %v1772_v9 = vmax.f32 %v1519_v0, 0.0 }
 0x24e   : > { %v1371_v3 = vpop.f32.mrf.mxu2 }
 0x24f   : > { %v1372_v39 = vadd.f32 %v1371_v3, %v3315_v44  ;;  %v3412_v4 = vadd.f32 %v1841_v41, %v1840_v32  ;;  %v1845_v17 = vmul.f32 %v3321_v1, %v1772_v9 }
 0x250   : > { %v1423_v5 = vpop.f32.mrf.mxu3  ;;  %v1472_v6 = vpop.f32.mrf.mxu0 }
 0x251   : > { %v1421_v54 = vadd.f32 %v1420_v52, %v1372_v39  ;;  %v1473_v10 = vadd.f32 %v1472_v6, %v3309_v16 }
 0x252   : > { %v1523_v11 = vpop.f32.mrf.mxu1 }
 0x253   : > { %v1771_v13 = vmax.f32 %v1421_v54, 0.0  ;;  %v1522_v18 = vadd.f32 %v1521_v43, %v1473_v10  ;;  %1569 = vmatmul.bf16.gmra.mxu2 %v3288_v27  ;;  %1667 = vmatmul.bf16.gmra.mxu0 %v3288_v27  ;;  %v3443_v10 = vperm.slane %v3304_v57, 3 }
 0x255   : > { %v1844_v19 = vmul.f32 %v3324_v8, %v1771_v13  ;;  %v1776_v29 = vmax.f32 %v1522_v18, 0.0 }
 0x256   : > { %v1374_v21 = vpop.f32.mrf.mxu2 }
 0x257   : > { %v1375_v53 = vadd.f32 %v1374_v21, %v3315_v44  ;;  %v3420_v22 = vadd.f32 %v1845_v17, %v1844_v19  ;;  %v1849_v27 = vmul.f32 %v3321_v1, %v1776_v29 }
 0x258   : > { %v1425_v23 = vpop.f32.mrf.mxu3  ;;  %v1474_v24 = vpop.f32.mrf.mxu0 }
 0x259   : > { %v1424_v63 = vadd.f32 %v1423_v5, %v1375_v53  ;;  %v1475_v30 = vadd.f32 %v1474_v24, %v3309_v16 }
 0x25a   : > { %v1526_v31 = vpop.f32.mrf.mxu1 }
 0x25b   : > { %v1775_v2 = vmax.f32 %v1424_v63, 0.0  ;;  %v1524_v34 = vadd.f32 %v1523_v11, %v1475_v30 }
 0x25d   : > { %v1848_v35 = vmul.f32 %v3324_v8, %v1775_v2  ;;  %1623 = vmatmul.bf16.gmra.mxu3 %v3295_v48  ;;  %1721 = vmatmul.bf16.gmra.mxu1 %v3295_v48  ;;  %v1780_v47 = vmax.f32 %v1524_v34, 0.0 }
 0x25e   : > { %v1376_v37 = vpop.f32.mrf.mxu2 }
 0x25f   : > { %v1377_v12 = vadd.f32 %v1376_v37, %v3315_v44  ;;  %v3428_v38 = vadd.f32 %v1849_v27, %v1848_v35  ;;  %v1853_v48 = vmul.f32 %v3321_v1, %v1780_v47  ;;  %v3457_v35 = vperm.slane %v3317_v62, 2 }
 0x260   : > { %v1428_v40 = vpop.f32.mrf.mxu3  ;;  %v1477_v42 = vpop.f32.mrf.mxu0 }
 0x261   : > { %v1426_v28 = vadd.f32 %v1425_v23, %v1377_v12  ;;  %v1478_v49 = vadd.f32 %v1477_v42, %v3309_v16  ;;  %v3449_v23 = vperm.slane %v3304_v57, 2 }
 0x262   : > { %v1528_v50 = vpop.f32.mrf.mxu1 }
 0x263   : > { %v1779_v14 = vmax.f32 %v1426_v28, 0.0  ;;  %v1527_v52 = vadd.f32 %v1526_v31, %v1478_v49  ;;  %1574 = vmatmul.bf16.gmra.mxu2 %v3300_v55  ;;  %1672 = vmatmul.bf16.gmra.mxu0 %v3300_v55 }
 0x265   : > { %v1852_v7 = vmul.f32 %v3324_v8, %v1779_v14  ;;  %v1784_v0 = vmax.f32 %v1527_v52, 0.0 }
 0x266   : > { %v1379_v58 = vpop.f32.mrf.mxu2 }
 0x267   : > { %v1380_v25 = vadd.f32 %v1379_v58, %v3315_v44  ;;  %v3436_v59 = vadd.f32 %v1853_v48, %v1852_v7  ;;  %v1857_v55 = vmul.f32 %v3321_v1, %v1784_v0 }
 0x268   : > { %v1430_v43 = vpop.f32.mrf.mxu3  ;;  %v1479_v60 = vpop.f32.mrf.mxu0 }
 0x269   : > { %v1429_v41 = vadd.f32 %v1428_v40, %v1380_v25  ;;  %v1480_v32 = vadd.f32 %v1479_v60, %v3309_v16 }
 0x26a   : > { %v1687_v3 = vpop.f32.mrf.mxu1 }
 0x26b   : > { %v1783_v39 = vmax.f32 %v1429_v41, 0.0  ;;  %v1529_v5 = vadd.f32 %v1528_v50, %v1480_v32 }
 0x26d   : > { %v1856_v6 = vmul.f32 %v3324_v8, %v1783_v39  ;;  %v1788_v17 = vmax.f32 %v1529_v5, 0.0 }
 0x26e   : > { %v1381_v9 = vpop.f32.mrf.mxu2 }
 0x26f   : > { %v1382_v54 = vadd.f32 %v1381_v9, %v3315_v44  ;;  %v3445_v11 = vadd.f32 %v1857_v55, %v1856_v6  ;;  %v1861_v24 = vmul.f32 %v3321_v1, %v1788_v17  ;;  %v3461_v1 = vperm.slane %v3317_v62, 3 }
 0x270   : > { %v1589_v13 = vpop.f32.mrf.mxu3  ;;  %v1638_v18 = vpop.f32.mrf.mxu0 }
 0x271   : > { %v1431_v19 = vadd.f32 %v1430_v43, %v1382_v54  ;;  %v1639_v53 = vadd.f32 %v1638_v18, %v3443_v10 }
 0x272   : > { %v1689_v16 = vpop.f32.mrf.mxu1 }
 0x273   : > { %v1787_v21 = vmax.f32 %v1431_v19, 0.0  ;;  %v1688_v63 = vadd.f32 %v1687_v3, %v1639_v53 }
 0x275   : > { %v1860_v44 = vmul.f32 %v3324_v8, %v1787_v21  ;;  %v1730_v12 = vmax.f32 %v1688_v63, 0.0 }
 0x276   : > { %v1540_v29 = vpop.f32.mrf.mxu2 }
 0x277   : > { %v1541_v30 = vadd.f32 %v1540_v29, %v3449_v23  ;;  %v3454_v31 = vadd.f32 %v1861_v24, %v1860_v44  ;;  %v1803_v49 = vmul.f32 %v3461_v1, %v1730_v12 }
 0x278   : > { %v1591_v2 = vpop.f32.mrf.mxu3  ;;  %v1640_v34 = vpop.f32.mrf.mxu0 }
 0x279   : > { %v1590_v27 = vadd.f32 %v1589_v13, %v1541_v30  ;;  %v1641_v40 = vadd.f32 %v1640_v34, %v3443_v10 }
 0x27a   : > { %v1692_v37 = vpop.f32.mrf.mxu1 }
 0x27b   : > { %v1729_v57 = vmax.f32 %v1590_v27, 0.0  ;;  %v1690_v47 = vadd.f32 %v1689_v16, %v1641_v40 }
 0x27d   : > { %v1802_v8 = vmul.f32 %v3457_v35, %v1729_v57  ;;  %v1734_v25 = vmax.f32 %v1690_v47, 0.0 }
 0x27e   : > { %v1542_v42 = vpop.f32.mrf.mxu2 }
 0x27f   : > { %v1543_v28 = vadd.f32 %v1542_v42, %v3449_v23  ;;  %v1865_v50 = vadd.f32 %v3332_v20, %v1802_v8  ;;  %v1807_v3 = vmul.f32 %v3461_v1, %v1734_v25 }
 0x280   : > { %v1594_v14 = vpop.f32.mrf.mxu3  ;;  %v1643_v52 = vpop.f32.mrf.mxu0 }
 0x281   : > { %v1592_v48 = vadd.f32 %v1591_v2, %v1543_v28  ;;  %v1866_v7 = vadd.f32 %v1865_v50, %v1803_v49  ;;  %v1644_v62 = vadd.f32 %v1643_v52, %v3443_v10 }
 0x282   : > { %v1694_v58 = vpop.f32.mrf.mxu1 }
 0x283   : > { %v1733_v43 = vmax.f32 %v1592_v48, 0.0  ;;  %1867 = vadd.xlane.f32.xlu0 %v1866_v7  ;;  %v1693_v41 = vadd.f32 %v1692_v37, %v1644_v62 }
 0x285   : > { %v1806_v60 = vmul.f32 %v3457_v35, %v1733_v43  ;;  %v1738_v54 = vmax.f32 %v1693_v41, 0.0 }
 0x286   : > { %v1545_v0 = vpop.f32.mrf.mxu2 }
 0x287   : > { %v1546_v32 = vadd.f32 %v1545_v0, %v3449_v23  ;;  %v1870_v20 = vadd.f32 %v3340_v36, %v1806_v60  ;;  %v1811_v53 = vmul.f32 %v3461_v1, %v1738_v54 }
 0x288   : > { %v1596_v39 = vpop.f32.mrf.mxu3  ;;  %v1645_v5 = vpop.f32.mrf.mxu0 }
 0x289   : > { %v1595_v55 = vadd.f32 %v1594_v14, %v1546_v32  ;;  %v1871_v6 = vadd.f32 %v1870_v20, %v1807_v3  ;;  %v1646_v18 = vadd.f32 %v1645_v5, %v3443_v10 }
 0x28a   : > { %v1697_v9 = vpop.f32.mrf.mxu1 }
 0x28b   : > { %v1737_v13 = vmax.f32 %v1595_v55, 0.0  ;;  %1872 = vadd.xlane.f32.xlu0 %v1871_v6  ;;  %v1695_v16 = vadd.f32 %v1694_v58, %v1646_v18 }
 0x28d   : > { %v1810_v17 = vmul.f32 %v3457_v35, %v1737_v13  ;;  %v1742_v2 = vmax.f32 %v1695_v16, 0.0 }
 0x28e   : > { %v1547_v19 = vpop.f32.mrf.mxu2 }
 0x28f   : > { %v1548_v21 = vadd.f32 %v1547_v19, %v3449_v23  ;;  %v1875_v36 = vadd.f32 %v3348_v56, %v1810_v17  ;;  %v1815_v8 = vmul.f32 %v3461_v1, %v1742_v2 }
 0x290   : > { %v1599_v24 = vpop.f32.mrf.mxu3  ;;  %v1648_v44 = vpop.f32.mrf.mxu0 }
 0x291   : > { %v1597_v29 = vadd.f32 %v1596_v39, %v1548_v21  ;;  %v1876_v63 = vadd.f32 %v1875_v36, %v1811_v53  ;;  %v1649_v27 = vadd.f32 %v1648_v44, %v3443_v10 }
 0x292   : > { %v1699_v30 = vpop.f32.mrf.mxu1 }
 0x293   : > { %v1741_v34 = vmax.f32 %v1597_v29, 0.0  ;;  %1877 = vadd.xlane.f32.xlu1 %v1876_v63  ;;  %v1698_v57 = vadd.f32 %v1697_v9, %v1649_v27 }
 0x295   : > { %v1814_v37 = vmul.f32 %v3457_v35, %v1741_v34  ;;  %v1746_v14 = vmax.f32 %v1698_v57, 0.0 }
 0x296   : > { %v1550_v12 = vpop.f32.mrf.mxu2 }
 0x297   : > { %v1551_v40 = vadd.f32 %v1550_v12, %v3449_v23  ;;  %v1880_v56 = vadd.f32 %v3356_v45, %v1814_v37  ;;  %v1819_v62 = vmul.f32 %v3461_v1, %v1746_v14 }
 0x298   : > { %v1601_v42 = vpop.f32.mrf.mxu3  ;;  %v1650_v47 = vpop.f32.mrf.mxu0 }
 0x299   : > { %v1600_v28 = vadd.f32 %v1599_v24, %v1551_v40  ;;  %v1881_v49 = vadd.f32 %v1880_v56, %v1815_v8  ;;  %v1651_v48 = vadd.f32 %v1650_v47, %v3443_v10 }
 0x29a   : > { %v1702_v50 = vpop.f32.mrf.mxu1 }
 0x29b   : > { %v1745_v52 = vmax.f32 %v1600_v28, 0.0  ;;  %1882 = vadd.xlane.f32.xlu1 %v1881_v49  ;;  %v1700_v25 = vadd.f32 %v1699_v30, %v1651_v48 }
 0x29d   : > { %v1818_v7 = vmul.f32 %v3457_v35, %v1745_v52  ;;  %v1750_v20 = vmax.f32 %v1700_v25, 0.0 }
 0x29e   : > { %v1552_v58 = vpop.f32.mrf.mxu2 }
 0x29f   : > { %v1553_v43 = vadd.f32 %v1552_v58, %v3449_v23  ;;  %v1885_v45 = vadd.f32 %v3364_v26, %v1818_v7  ;;  %v1823_v13 = vmul.f32 %v3461_v1, %v1750_v20 }
 0x2a0   : > { %v1604_v60 = vpop.f32.mrf.mxu3  ;;  %v1653_v0 = vpop.f32.mrf.mxu0 }
 0x2a1   : > { %v1602_v41 = vadd.f32 %v1601_v42, %v1553_v43  ;;  %v1886_v32 = vadd.f32 %v1885_v45, %v1819_v62  ;;  %v1654_v5 = vadd.f32 %v1653_v0, %v3443_v10 }
 0x2a2   : > { %v1704_v3 = vpop.f32.mrf.mxu1 }
 0x2a3   : > { %v1749_v39 = vmax.f32 %v1602_v41, 0.0  ;;  %1887 = vadd.xlane.f32.xlu2 %v1886_v32  ;;  %v1703_v9 = vadd.f32 %v1702_v50, %v1654_v5 }
 0x2a5   : > { %v1822_v55 = vmul.f32 %v3457_v35, %v1749_v39  ;;  %v1754_v53 = vmax.f32 %v1703_v9, 0.0 }
 0x2a6   : > { %v1555_v6 = vpop.f32.mrf.mxu2 }
 0x2a7   : > { %v1556_v54 = vadd.f32 %v1555_v6, %v3449_v23  ;;  %v1890_v26 = vadd.f32 %v3372_v46, %v1822_v55  ;;  %v1827_v2 = vmul.f32 %v3461_v1, %v1754_v53 }
 0x2a8   : > { %v1606_v18 = vpop.f32.mrf.mxu3  ;;  %v1655_v17 = vpop.f32.mrf.mxu0 }
 0x2a9   : > { %v1605_v19 = vadd.f32 %v1604_v60, %v1556_v54  ;;  %v1891_v16 = vadd.f32 %v1890_v26, %v1823_v13  ;;  %v1656_v24 = vadd.f32 %v1655_v17, %v3443_v10 }
 0x2aa   : > { %v1707_v21 = vpop.f32.mrf.mxu1 }
 0x2ab   : > { %v1753_v36 = vmax.f32 %v1605_v19, 0.0  ;;  %1892 = vadd.xlane.f32.xlu2 %v1891_v16  ;;  %v1705_v63 = vadd.f32 %v1704_v3, %v1656_v24 }
 0x2ad   : > { %v1826_v44 = vmul.f32 %v3457_v35, %v1753_v36  ;;  %v1758_v40 = vmax.f32 %v1705_v63, 0.0 }
 0x2ae   : > { %v1557_v29 = vpop.f32.mrf.mxu2 }
 0x2af   : > { %v1558_v30 = vadd.f32 %v1557_v29, %v3449_v23  ;;  %v1895_v46 = vadd.f32 %v3380_v61, %v1826_v44  ;;  %v1831_v50 = vmul.f32 %v3461_v1, %v1758_v40 }
 0x2b0   : > { %v1609_v34 = vpop.f32.mrf.mxu3  ;;  %v1658_v27 = vpop.f32.mrf.mxu0 }
 0x2b1   : > { %v1607_v37 = vadd.f32 %v1606_v18, %v1558_v30  ;;  %v1896_v12 = vadd.f32 %v1895_v46, %v1827_v2  ;;  %v1659_v56 = vadd.f32 %v1658_v27, %v3443_v10 }
 0x2b2   : > { %v1709_v57 = vpop.f32.mrf.mxu1 }
 0x2b3   : > { %v1757_v8 = vmax.f32 %v1607_v37, 0.0  ;;  %1897 = vadd.xlane.f32.xlu0 %v1896_v12  ;;  %v1708_v28 = vadd.f32 %v1707_v21, %v1659_v56 }
 0x2b5   : > { %v1830_v42 = vmul.f32 %v3457_v35, %v1757_v8  ;;  %v1762_v58 = vmax.f32 %v1708_v28, 0.0 }
 0x2b6   : > { %v1560_v47 = vpop.f32.mrf.mxu2 }
 0x2b7   : > { %v1561_v49 = vadd.f32 %v1560_v47, %v3449_v23  ;;  %v1900_v61 = vadd.f32 %v3388_v15, %v1830_v42  ;;  %v1835_v32 = vmul.f32 %v3461_v1, %v1762_v58 }
 0x2b8   : > { %v1611_v14 = vpop.f32.mrf.mxu3  ;;  %v1660_v52 = vpop.f32.mrf.mxu0 }
 0x2b9   : > { %v1610_v48 = vadd.f32 %v1609_v34, %v1561_v49  ;;  %v1901_v7 = vadd.f32 %v1900_v61, %v1831_v50  ;;  %v1661_v43 = vadd.f32 %v1660_v52, %v3443_v10 }
 0x2ba   : > { %v1712_v62 = vpop.f32.mrf.mxu1 }
 0x2bb   : > { %v1761_v25 = vmax.f32 %v1610_v48, 0.0  ;;  %1902 = vadd.xlane.f32.xlu1 %v1901_v7  ;;  %v1710_v0 = vadd.f32 %v1709_v57, %v1661_v43 }
 0x2bd   : > { %v1834_v45 = vmul.f32 %v3457_v35, %v1761_v25  ;;  %v1766_v55 = vmax.f32 %v1710_v0, 0.0 }
 0x2be   : > { %v1562_v60 = vpop.f32.mrf.mxu2 }
 0x2bf   : > { %v1563_v41 = vadd.f32 %v1562_v60, %v3449_v23  ;;  %v1905_v15 = vadd.f32 %v3396_v33, %v1834_v45  ;;  %v1839_v19 = vmul.f32 %v3461_v1, %v1766_v55 }
 0x2c0   : > { %v1614_v3 = vpop.f32.mrf.mxu3  ;;  %v1663_v20 = vpop.f32.mrf.mxu0 }
 0x2c1   : > { %v1612_v39 = vadd.f32 %v1611_v14, %v1563_v41  ;;  %v1906_v5 = vadd.f32 %v1905_v15, %v1835_v32  ;;  %v1664_v9 = vadd.f32 %v1663_v20, %v3443_v10 }
 0x2c2   : > { %v1714_v13 = vpop.f32.mrf.mxu1 }
 0x2c3   : > { %v1765_v6 = vmax.f32 %v1612_v39, 0.0  ;;  %1907 = vadd.xlane.f32.xlu2 %v1906_v5  ;;  %v1713_v18 = vadd.f32 %v1712_v62, %v1664_v9 }
 0x2c5   : > { %v1838_v54 = vmul.f32 %v3457_v35, %v1765_v6  ;;  %v1770_v24 = vmax.f32 %v1713_v18, 0.0 }
 0x2c6   : > { %v1565_v26 = vpop.f32.mrf.mxu2 }
 0x2c7   : > { %v1566_v17 = vadd.f32 %v1565_v26, %v3449_v23  ;;  %v1910_v33 = vadd.f32 %v3404_v51, %v1838_v54  ;;  %v1843_v34 = vmul.f32 %v3461_v1, %v1770_v24 }
 0x2c8   : > { %v1616_v16 = vpop.f32.mrf.mxu3  ;;  %v1665_v21 = vpop.f32.mrf.mxu0 }
 0x2c9   : > { %v1615_v53 = vadd.f32 %v1614_v3, %v1566_v17  ;;  %v1911_v36 = vadd.f32 %v1910_v33, %v1839_v19  ;;  %v1666_v29 = vadd.f32 %v1665_v21, %v3443_v10  ;;  %v3021_v3 = vmov 0  }
 0x2ca   : > { %v1717_v51 = vpop.f32.mrf.mxu1  ;;  %2850 = vset.pattern.permute.xlu1 %v3021_v3  ;;  %2851 = vset.pattern.permute.xlu2 %v3021_v3 }
 0x2cb   : > { %v1769_v44 = vmax.f32 %v1615_v53, 0.0  ;;  %1912 = vadd.xlane.f32.xlu0 %v1911_v36  ;;  %v1715_v2 = vadd.f32 %v1714_v13, %v1666_v29 }
 0x2cc   : > { %2852 = vset.pattern.permute.xlu0 %v3021_v3 }
 0x2cd   : > { %v1842_v63 = vmul.f32 %v3457_v35, %v1769_v44  ;;  %v1774_v56 = vmax.f32 %v1715_v2, 0.0 }
 0x2ce   : > { %v1567_v30 = vpop.f32.mrf.mxu2 }
 0x2cf   : > { %v1568_v46 = vadd.f32 %v1567_v30, %v3449_v23  ;;  %v1915_v27 = vadd.f32 %v3412_v4, %v1842_v63  ;;  %v1847_v61 = vmul.f32 %v3461_v1, %v1774_v56 }
 0x2d0   : > { %v1668_v37 = vpop.f32.mrf.mxu0  ;;  %v1619_v40 = vpop.f32.mrf.mxu3 }
 0x2d1   : > { %v1617_v12 = vadd.f32 %v1616_v16, %v1568_v46  ;;  %v1916_v57 = vadd.f32 %v1915_v27, %v1843_v34  ;;  %v1669_v8 = vadd.f32 %v1668_v37, %v3443_v10 }
 0x2d2   : > { %v1719_v58 = vpop.f32.mrf.mxu1 }
 0x2d3   : > { %v1773_v42 = vmax.f32 %v1617_v12, 0.0  ;;  %1917 = vadd.xlane.f32.xlu1 %v1916_v57  ;;  %v1718_v28 = vadd.f32 %v1717_v51, %v1669_v8 }
 0x2d5   : > { %v1846_v47 = vmul.f32 %v3457_v35, %v1773_v42  ;;  %v1778_v7 = vmax.f32 %v1718_v28, 0.0 }
 0x2d6   : > { %v1570_v49 = vpop.f32.mrf.mxu2 }
 0x2d7   : > { %v1571_v50 = vadd.f32 %v1570_v49, %v3449_v23  ;;  %v1920_v4 = vadd.f32 %v3420_v22, %v1846_v47  ;;  %v1851_v0 = vmul.f32 %v3461_v1, %v1778_v7 }
 0x2d8   : > { %v1670_v14 = vpop.f32.mrf.mxu0  ;;  %v1621_v62 = vpop.f32.mrf.mxu3 }
 0x2d9   : > { %v1620_v52 = vadd.f32 %v1619_v40, %v1571_v50  ;;  %v1921_v48 = vadd.f32 %v1920_v4, %v1847_v61  ;;  %v1671_v43 = vadd.f32 %v1670_v14, %v3443_v10 }
 0x2da   : > { %v1722_v9 = vpop.f32.mrf.mxu1 }
 0x2db   : > { %v1777_v25 = vmax.f32 %v1620_v52, 0.0  ;;  %1922 = vadd.xlane.f32.xlu2 %v1921_v48  ;;  %v1720_v41 = vadd.f32 %v1719_v58, %v1671_v43 }
 0x2dd   : > { %v1850_v45 = vmul.f32 %v3457_v35, %v1777_v25  ;;  %v1782_v5 = vmax.f32 %v1720_v41, 0.0 }
 0x2de   : > { %v1572_v60 = vpop.f32.mrf.mxu2 }
 0x2df   : > { %v1573_v32 = vadd.f32 %v1572_v60, %v3449_v23  ;;  %v1925_v22 = vadd.f32 %v3428_v38, %v1850_v45  ;;  %v1855_v17 = vmul.f32 %v3461_v1, %v1782_v5 }
 0x2e0   : > { %v1673_v15 = vpop.f32.mrf.mxu0  ;;  %v1624_v13 = vpop.f32.mrf.mxu3 }
 0x2e1   : > { %v1622_v20 = vadd.f32 %v1621_v62, %v1573_v32  ;;  %v1926_v39 = vadd.f32 %v1925_v22, %v1851_v0  ;;  %v1674_v6 = vadd.f32 %v1673_v15, %v3443_v10 }
 0x2e2   : > { %v1724_v29 = vpop.f32.mrf.mxu1 }
 0x2e3   : > { %v1781_v55 = vmax.f32 %v1622_v20, 0.0  ;;  %1927 = vadd.xlane.f32.xlu0 %v1926_v39  ;;  %v1723_v18 = vadd.f32 %v1722_v9, %v1674_v6 }
 0x2e5   : > { %v1854_v54 = vmul.f32 %v3457_v35, %v1781_v55  ;;  %v1786_v53 = vmax.f32 %v1723_v18, 0.0 }
 0x2e6   : > { %v1575_v26 = vpop.f32.mrf.mxu2 }
 0x2e7   : > { %v1576_v38 = vadd.f32 %v1575_v26, %v3449_v23  ;;  %v1930_v19 = vadd.f32 %v3436_v59, %v1854_v54  ;;  %v1859_v46 = vmul.f32 %v3461_v1, %v1786_v53  ;;  %v2024_v26 = vlaneseq }
 0x2e8   : > { %v1675_v33 = vpop.f32.mrf.mxu0  ;;  %v1626_v59 = vpop.f32.mrf.mxu3 }
 0x2e9   : > { %v1625_v16 = vadd.f32 %v1624_v13, %v1576_v38  ;;  %v1931_v21 = vadd.f32 %v1930_v19, %v1855_v17  ;;  %v1676_v24 = vadd.f32 %v1675_v33, %v3443_v10  ;;  %v3540_v18 = vand.u32 127, %v2024_v26 }
 0x2eb   : > { %v1785_v36 = vmax.f32 %v1625_v16, 0.0  ;;  %1932 = vadd.xlane.f32.xlu1 %v1931_v21  ;;  %v1725_v30 = vadd.f32 %v1724_v29, %v1676_v24  ;;  %v2031_v19 = vadd.s32 4294967280, %v3540_v18  ;;  %v2027_v33 = vadd.s32 4294967288, %v3540_v18 }
 0x2ed   : > { %v1858_v44 = vmul.f32 %v3457_v35, %v1785_v36  ;;  %v1790_v37 = vmax.f32 %v1725_v30, 0.0  ;;  %v2039_v36 = vadd.s32 4294967264, %v3540_v18 }
 0x2ee   : > { %v1577_v63 = vpop.f32.mrf.mxu2 }
 0x2ef   : > { %v1578_v2 = vadd.f32 %v1577_v63, %v3449_v23  ;;  %v1935_v34 = vadd.f32 %v3445_v11, %v1858_v44  ;;  %v1863_v57 = vmul.f32 %v3461_v1, %v1790_v37  ;;  %v341_v23 = vld [vmem:[#allocation7 + $0x4] ss:$0 sm:$0xff]  ;;  %v2035_v44 = vadd.s32 4294967272, %v3540_v18 }
 0x2f1   : > { %v1627_v27 = vadd.f32 %v1626_v59, %v1578_v2  ;;  %v1936_v51 = vadd.f32 %v1935_v34, %v1859_v46  ;;  %v2047_v34 = vadd.s32 4294967248, %v3540_v18 }
 0x2f3   : > { %v1789_v12 = vmax.f32 %v1627_v27, 0.0  ;;  %1937 = vadd.xlane.f32.xlu2 %v1936_v51  ;;  %v2043_v27 = vadd.s32 4294967256, %v3540_v18 }
 0x2f5   : > { %v1862_v10 = vmul.f32 %v3457_v35, %v1789_v12 }
 0x2f6   : > { %v1868_v56 = vpop.xlane.xlu0 %1867 }
 0x2f7   : > { %v1940_v40 = vadd.f32 %v3454_v31, %v1862_v10  ;;  %v1944_v42 = vadd.f32 %v1868_v56, %v341_v23  ;;  %v2059_v56 = vadd.s32 4294967224, %v3540_v18 }
 0x2f9   : > { %v1941_v8 = vadd.f32 %v1940_v40, %v1863_v57  ;;  %v2055_v57 = vadd.s32 4294967232, %v3540_v18 }
 0x2fb   : > { %1942 = vadd.xlane.f32.xlu0 %v1941_v8  ;;  %v2051_v8 = vadd.s32 4294967240, %v3540_v18 }
 0x2fe   : > { %v1873_v47 = vpop.xlane.xlu0 %1872 }
 0x2ff   : > { %v1945_v28 = vadd.f32 %v1873_v47, %v341_v23 }
 0x304   : > { %1977 = vperm.xlu1 %2850, %v1944_v42  }
 0x306   : > { %v1878_v11 = vpop.xlane.xlu1 %1877 }
 0x307   : > { %v1946_v49 = vadd.f32 %v1878_v11, %v341_v23 }
 0x30b   : > { %1980 = vperm.xlu2 %2851, %v1945_v28  }
 0x30e   : > { %v1883_v50 = vpop.xlane.xlu1 %1882 }
 0x30f   : > { %1983 = vperm.xlu0 %2852, %v1946_v49   ;;  %v1947_v61 = vadd.f32 %v1883_v50, %v341_v23 }
 0x313   : > { %1986 = vperm.xlu2 %2851, %v1947_v61   ;;  %v2067_v61 = vadd.s32 4294967208, %v3540_v18 }
 0x316   : > { %v1888_v35 = vpop.xlane.xlu2 %1887 }
 0x317   : > { %v1948_v4 = vadd.f32 %v1888_v35, %v341_v23  ;;  %v2063_v35 = vadd.s32 4294967216, %v3540_v18 }
 0x319   : > { %1989 = vperm.xlu1 %2850, %v1948_v4   ;;  %v2071_v4 = vadd.s32 4294967200, %v3540_v18 }
 0x31e   : > { %v1893_v1 = vpop.xlane.xlu2 %1892 }
 0x31f   : > { %v1949_v31 = vadd.f32 %v1893_v1, %v341_v23 }
 0x321   : > { %1992 = vperm.xlu2 %2851, %v1949_v31  }
 0x326   : > { %v1898_v14 = vpop.xlane.xlu0 %1897 }
 0x327   : > { %v1950_v52 = vadd.f32 %v1898_v14, %v341_v23 }
 0x329   : > { %1995 = vperm.xlu1 %2850, %v1950_v52  }
 0x32e   : > { %v1903_v48 = vpop.xlane.xlu1 %1902 }
 0x32f   : > { %v1951_v7 = vadd.f32 %v1903_v48, %v341_v23 }
 0x331   : > { %1998 = vperm.xlu2 %2851, %v1951_v7  }
 0x336   : > { %v1908_v58 = vpop.xlane.xlu2 %1907 }
 0x337   : > { %v1952_v25 = vadd.f32 %v1908_v58, %v341_v23 }
 0x339   : > { %2001 = vperm.xlu1 %2850, %v1952_v25   ;;  %v2079_v25 = vadd.s32 4294967184, %v3540_v18 }
 0x33e   : > { %v1913_v43 = vpop.xlane.xlu0 %1912 }
 0x33f   : > { %v1953_v62 = vadd.f32 %v1913_v43, %v341_v23  ;;  %v2075_v43 = vadd.s32 4294967192, %v3540_v18 }
 0x341   : > { %2004 = vperm.xlu0 %2852, %v1953_v62  }
 0x346   : > { %v1918_v45 = vpop.xlane.xlu1 %1917 }
 0x347   : > { %v1954_v60 = vadd.f32 %v1918_v45, %v341_v23 }
 0x349   : > { %2007 = vperm.xlu2 %2851, %v1954_v60  }
 0x34e   : > { %v1923_v0 = vpop.xlane.xlu2 %1922 }
 0x34f   : > { %v1955_v41 = vadd.f32 %v1923_v0, %v341_v23 }
 0x351   : > { %2010 = vperm.xlu1 %2850, %v1955_v41   ;;  %v2083_v41 = vadd.s32 4294967176, %v3540_v18 }
 0x356   : > { %v1928_v32 = vpop.xlane.xlu0 %1927 }
 0x357   : > { %v1956_v22 = vadd.f32 %v1928_v32, %v341_v23 }
 0x359   : > { %2013 = vperm.xlu0 %2852, %v1956_v22  }
 0x35e   : > { %v1933_v15 = vpop.xlane.xlu1 %1932 }
 0x35f   : > { %v1957_v3 = vadd.f32 %v1933_v15, %v341_v23 }
 0x361   : > { %2016 = vperm.xlu2 %2851, %v1957_v3  }
 0x366   : > { %v1938_v20 = vpop.xlane.xlu2 %1937 }
 0x367   : > { %v1958_v39 = vadd.f32 %v1938_v20, %v341_v23 }
 0x369   : > { %2019 = vperm.xlu1 %2850, %v1958_v39  }
 0x36e   : > { %v1943_v5 = vpop.xlane.xlu0 %1942  ;;  %v1981_v6 = vpop.permute.xlu2 %1980 }
 0x36f   : > { %v1959_v55 = vadd.f32 %v1943_v5, %v341_v23  ;;  %v2028_v24 = vperm.slane %v1981_v6, %v2027_v33 }
 0x371   : > { %2022 = vperm.xlu0 %2852, %v1959_v55  }
 0x376   : > { %v1978_v9 = vpop.permute.xlu1 %1977  ;;  %v1987_v54 = vpop.permute.xlu2 %1986 }
 0x377   : > { %v2026_v21 = vperm.slane %v1978_v9, %v3540_v18  ;;  %v2036_v59 = vperm.slane %v1987_v54, %v2035_v44 }
 0x379   : > { %v2030_v29 = vsel %vm2029_vm0, %v2028_v24, %v2026_v21 }
 0x37e   : > { %v1993_v17 = vpop.permute.xlu2 %1992 }
 0x37f   : > { %v2044_v40 = vperm.slane %v1993_v17, %v2043_v27 }
 0x381   : > { %v1984_v16 = vpop.permute.xlu0 %1983 }
 0x382   : > { %v2032_v53 = vperm.slane %v1984_v16, %v2031_v19 }
 0x384   : > { %v2034_v30 = vsel %vm2033_vm1, %v2032_v53, %v2030_v29 }
 0x385   : > { %v2038_v51 = vsel %vm2037_vm2, %v2036_v59, %v2034_v30 }
 0x38b   : > { %v1990_v13 = vpop.permute.xlu1 %1989  ;;  %v1999_v46 = vpop.permute.xlu2 %1998 }
 0x38c   : > { %v2040_v2 = vperm.slane %v1990_v13, %v2039_v36  ;;  %v2052_v49 = vperm.slane %v1999_v46, %v2051_v8 }
 0x38e   : > { %v2042_v12 = vsel %vm2041_vm3, %v2040_v2, %v2038_v51 }
 0x38f   : > { %v2046_v23 = vsel %vm2045_vm4, %v2044_v40, %v2042_v12 }
 0x39b   : > { %v1996_v38 = vpop.permute.xlu1 %1995 }
 0x39c   : > { %v2048_v10 = vperm.slane %v1996_v38, %v2047_v34 }
 0x39e   : > { %v2050_v47 = vsel %vm2049_vm5, %v2048_v10, %v2046_v23 }
 0x39f   : > { %v2054_v1 = vsel %vm2053_vm6, %v2052_v49, %v2050_v47 }
 0x3a3   : > { %v2008_v11 = vpop.permute.xlu2 %2007 }
 0x3a4   : > { %v2064_v7 = vperm.slane %v2008_v11, %v2063_v35 }
 0x3ab   : > { %v2002_v63 = vpop.permute.xlu1 %2001 }
 0x3ac   : > { %v2056_v28 = vperm.slane %v2002_v63, %v2055_v57 }
 0x3ae   : > { %v2058_v14 = vsel %vm2057_vm7, %v2056_v28, %v2054_v1 }
 0x3b3   : > { %v2005_v37 = vpop.permute.xlu0 %2004 }
 0x3b4   : > { %v2060_v50 = vperm.slane %v2005_v37, %v2059_v56 }
 0x3b6   : > { %v2062_v52 = vsel %vm2061_vm8, %v2060_v50, %v2058_v14 }
 0x3b7   : > { %v2066_v60 = vsel %vm2065_vm9, %v2064_v7, %v2062_v52 }
 0x3bb   : > { %v2017_v45 = vpop.permute.xlu2 %2016 }
 0x3bc   : > { %v2076_v15 = vperm.slane %v2017_v45, %v2075_v43 }
 0x3c3   : > { %v2011_v42 = vpop.permute.xlu1 %2010 }
 0x3c4   : > { %v2068_v48 = vperm.slane %v2011_v42, %v2067_v61 }
 0x3c6   : > { %v2070_v0 = vsel %vm2069_vm10, %v2068_v48, %v2066_v60 }
 0x3cb   : > { %v2014_v31 = vpop.permute.xlu0 %2013 }
 0x3cc   : > { %v2072_v58 = vperm.slane %v2014_v31, %v2071_v4 }
 0x3ce   : > { %v2074_v32 = vsel %vm2073_vm11, %v2072_v58, %v2070_v0 }
 0x3cf   : > { %v2078_v20 = vsel %vm2077_vm12, %v2076_v15, %v2074_v32 }
 0x3db   : > { %v2020_v62 = vpop.permute.xlu1 %2019 }
 0x3dc   : > { %v2080_v22 = vperm.slane %v2020_v62, %v2079_v25 }
 0x3de   : > { %v2082_v5 = vsel %vm2081_vm13, %v2080_v22, %v2078_v20 }
 0x3e3   : > { %v2023_v3 = vpop.permute.xlu0 %2022 }
 0x3e4   : > { %v2084_v39 = vperm.slane %v2023_v3, %v2083_v41 }
 0x3e6   : > { %v2086_v55 = vsel %vm2085_vm14, %v2084_v39, %v2082_v5 }
 0x3e7   : > { %2088 = vst [vmem:[%s220_s27] sm:$0x1] %v2086_v55 }
 0x3e8   : > { %2970 = shalt.err (!%p2967_p10)
}
 0x3e9   : > { %2788 = dma.vmem_to_hbm [thread:$0]  (%p3108_p3), %s2101_s28, 16, %s2103_s29, %s2090_s16  }
 0x3ea PF: > { %s2114_s21 = sand.u32 1, %s3001_s12   ;;  %p3601_p12 = scmp.ge.s32.totalorder %s3013_s15, 2 }
 0x3eb   : > { %s2115_s22 = scalar_lea.sflag [#allocation4], %s2114_s21 }
 0x3ec   : > { %p2802_p13 = pnand %p3601_p12, %p3077_p6 }
 0x3ee   : > { %p2803_p0 = pneg %p2802_p13 }
 0x3f0   : > { %2996 = dma.done.wait (%p2803_p0), %s2115_s22, 16  }
 0x3f1   : > { %2998 = vsyncadd (%p2803_p0), %s2115_s22, 4294967280  ;;  %p17_p5 = scmp.ge.s32.totalorder %s3098_s6, 4   ;;  %s3602_s12 = smov %s3005_s13 }
 0x3f2   : > { %s3603_s13 = smov %s3009_s14  ;;  %s3604_s14 = smov %s3114_s10 }
 0x3f3   : > { %s3605_s15 = smov %s3098_s6  ;;  %19 = sbr.rel (!%p17_p5) target bundleno = 6 (0x6), region = 88 }
 0x3f8   :  { %2120 = vsyncpa [#allocation3], 1 }
 0x3f9   :  { %2122 = vsyncpa [#allocation3 + $0x1], 1 }
 0x3fa   :  { %2123 = vsyncpa [#allocation6], 1 }
 0x3fb   :  { %2124 = vsyncpa [#allocation4], 1 }
 0x3fc   :  { %2126 = vsyncpa [#allocation4 + $0x1], 1 }

</bundles_post_ra>
